<compile_context>
chip_gen: v7x
topology: tpu7x:2x2x1
jax: 0.10.0
libtpu: 0.0.40
codegen_flags: <defaults>
</compile_context>

<pallas_src>
import functools

import jax
import jax.numpy as jnp
from jax.experimental import pallas as pl
from jax.experimental.pallas import tpu as pltpu

L = 5       # LS_SVM hard-codes a 5x5 code matrix M, so n_way must be 5
LANE = 128  # vreg lane width; the task axis is tiled in multiples of this


def _m_code(dtype=jnp.float32):
    # +1 on the diagonal, -1 off-diagonal (the torch module's global M).
    return 2.0 * jnp.eye(L, dtype=dtype) - 1.0


def _round_up(x, m):
    return -(-x // m) * m


# ----------------- Pallas kernel 1: regularized Gram + compatibility -----------------
def _gram_kernel(sup_ref, qry_ref, greg_ref, compat_ref, *, C_reg):
    # sup_ref: (S, d, TB)   qry_ref: (Q, d, TB)   -- tasks live on the 128-lane axis
    sup = sup_ref[...]
    qry = qry_ref[...]
    # K[i, j, b] = support[b, i, :] . support[b, j, :]   (exact f32, lane-parallel VPU)
    k = jnp.sum(sup[:, None, :, :] * sup[None, :, :, :], axis=2)          # (S, S, TB)
    row = jax.lax.broadcasted_iota(jnp.int32, k.shape, 0)
    col = jax.lax.broadcasted_iota(jnp.int32, k.shape, 1)
    greg_ref[...] = k + jnp.where(row == col, jnp.float32(C_reg), jnp.float32(0.0))
    # compat_t[q, j, b] = query[b, q, :] . support[b, j, :]
    compat_ref[...] = jnp.sum(qry[:, None, :, :] * sup[None, :, :, :], axis=2)


def gram_compat(sup_t, qry_t, *, TB, C_reg, vmem_limit):
    S, d, Bp = sup_t.shape
    Q = qry_t.shape[0]
    kernel = functools.partial(_gram_kernel, C_reg=C_reg)
    return pl.pallas_call(
        kernel,
        out_shape=(jax.ShapeDtypeStruct((S, S, Bp), jnp.float32),
                   jax.ShapeDtypeStruct((Q, S, Bp), jnp.float32)),
        grid=(Bp // TB,),
        in_specs=[pl.BlockSpec((S, d, TB), lambda b: (0, 0, b)),
                  pl.BlockSpec((Q, d, TB), lambda b: (0, 0, b))],
        out_specs=(pl.BlockSpec((S, S, TB), lambda b: (0, 0, b)),
                   pl.BlockSpec((Q, S, TB), lambda b: (0, 0, b))),
        compiler_params=pltpu.CompilerParams(
            dimension_semantics=("parallel",),
            vmem_limit_bytes=int(vmem_limit)),
    )(sup_t, qry_t)


# ------------------ Pallas kernel 2: scores with folded M / bias / scale --------------
def _logits_kernel(compat_ref, w_ref, wb_ref, o_ref):
    # compat_ref: (Q, S, TB)  w_ref: (L, S, TB)  wb_ref: (1, L, TB)
    # out[q, w, b] = sum_s compat[q, s, b] * W[w, s, b] + Wb[w, b]
    # (the 5x5 decode matrix M, the bias and the scale are folded into W/Wb in glue)
    c = compat_ref[...]
    w = w_ref[...]
    o_ref[...] = jnp.sum(c[:, None, :, :] * w[None, :, :, :], axis=2) + wb_ref[...]


def logits_head(compat_t, w, wb, *, TB, vmem_limit):
    Q, S, Bp = compat_t.shape
    return pl.pallas_call(
        _logits_kernel,
        out_shape=jax.ShapeDtypeStruct((Q, L, Bp), jnp.float32),
        grid=(Bp // TB,),
        in_specs=[pl.BlockSpec((Q, S, TB), lambda b: (0, 0, b)),
                  pl.BlockSpec((L, S, TB), lambda b: (0, 0, b)),
                  pl.BlockSpec((1, L, TB), lambda b: (0, 0, b))],
        out_specs=pl.BlockSpec((Q, L, TB), lambda b: (0, 0, b)),
        compiler_params=pltpu.CompilerParams(
            dimension_semantics=("parallel",),
            vmem_limit_bytes=int(vmem_limit)),
    )(compat_t, w, wb)


# ----------------------------------- tiling helpers -----------------------------------
def _col_bytes(shape):
    # f32 bytes per task (per lane) of a batch-last VMEM array whose non-batch
    # shape is `shape`; the second-to-last (sublane) dim pads to 8.
    lead = 1
    for v in shape[:-1]:
        lead *= v
    return lead * _round_up(shape[-1], 8) * 4


def _tpu_config():
    """Generation-aware VMEM limit + number of TensorCores sharing the grid."""
    limit, cores = 32 << 20, 1            # conservative default
    try:
        kind = (jax.devices()[0].device_kind or "").lower()
        if "v5" in kind or "v6" in kind:
            limit, cores = 100 << 20, 1   # 128 MiB physical, single TensorCore
        elif "v7" in kind or "7x" in kind:
            limit, cores = 48 << 20, 2    # 64 MiB physical per TC, 2 TCs per chip
    except Exception:
        pass
    return limit, cores


def _choose_tiling(B, S, Q, d, limit, cores, tb_cap=None):
    # Per-task VMEM footprint of each kernel: inputs + outputs + in-kernel
    # broadcast temporaries (explicitly accounted for), x2 for the
    # double-buffered pipeline.
    k1 = sum(_col_bytes(s) for s in
             [(S, d), (Q, d), (S, S, d), (Q, S, d), (S, S), (Q, S)])
    k2 = sum(_col_bytes(s) for s in
             [(Q, S), (L, S), (1, L), (Q, L, S), (Q, L)])
    per_task = 2 * max(k1, k2)
    budget = int(limit * 0.7)             # headroom for Mosaic internal scratch
    tb_fit = max(LANE, (budget // per_task) // LANE * LANE)
    if tb_cap is not None:
        tb_fit = max(LANE, min(tb_fit, _round_up(int(tb_cap), LANE)))
    TB = min(tb_fit, _round_up(B, LANE))
    nblk = -(-_round_up(B, LANE) // TB)
    if cores >= 2 and nblk > 1 and nblk % 2 == 1:
        nblk += 1                          # even block counts balance both v7x TCs
    Bp = nblk * TB
    return TB, Bp


# ------------------------------------------ glue --------------------------------------
@functools.partial(jax.jit,
                   static_argnames=('n_way', 'n_shot', 'C_reg', 'tb_cap'))
def ls_svm_head(query, support, support_labels, scale, *, n_way, n_shot,
                C_reg=0.1, tb_cap=None):
    assert n_way == L, "LS_SVM head hard-codes n_way == 5"
    del n_shot  # unused by the LS-SVM math (matches the torch code)
    B, Q, d = query.shape
    S = support.shape[1]
    M_CODE = _m_code()

    limit, cores = _tpu_config()
    TB, Bp = _choose_tiling(B, S, Q, d, limit, cores, tb_cap)

    def to_lane_last(x):                  # (B, n, k) -> (n, k, Bp) f32, tasks on lanes
        xt = jnp.transpose(x.astype(jnp.float32), (1, 2, 0))
        return jnp.pad(xt, ((0, 0), (0, 0), (0, Bp - B))) if Bp > B else xt

    sup_t = to_lane_last(support)                                 # (S, d, Bp)
    qry_t = to_lane_last(query)                                   # (Q, d, Bp)

    # Pallas kernel 1: K + C*I and compat^T, both batch-last / lane-dense.
    greg, compat_t = gram_compat(sup_t, qry_t, TB=TB, C_reg=float(C_reg),
                                 vmem_limit=limit)

    # ---- tiny XLA glue: collapsed KKT system, one (S+1)x(S+1) solve with L RHS ----
    # With alpha_l = y_l * beta_l (y in {+-1}) the original system
    #   [[-2I, Ybd],[Ybd^T, Gbd]] collapses, per class l, to
    #   [[-2, 1^T],[1, K + C*I]] [b_l; beta_l] = [0; y_l].
    g_b = jnp.transpose(greg[:, :, :B], (2, 0, 1))                # (B, S, S)
    top = jnp.concatenate([jnp.full((B, 1, 1), -2.0, jnp.float32),
                           jnp.ones((B, 1, S), jnp.float32)], axis=2)
    bot = jnp.concatenate([jnp.ones((B, S, 1), jnp.float32), g_b], axis=2)
    mat = jnp.concatenate([top, bot], axis=1)                     # (B, S+1, S+1)

    onehot = jax.nn.one_hot(support_labels, n_way, dtype=jnp.float32)
    ysl = 2.0 * onehot - 1.0                                      # encoding(labels), (B, S, L)
    rhs = jnp.concatenate([jnp.zeros((B, 1, L), jnp.float32), ysl], axis=1)

    # TODO(synk): the dense batched LU solve (torch.solve) has no Pallas TPU
    # primitive; it stays in XLA glue (now ~125x fewer FLOPs than the original
    # L*(S+1)-sized KKT system).
    sol = jnp.linalg.solve(mat, rhs)                              # (B, S+1, L)
    bias = sol[:, 0, :]                                           # (B, L)
    beta = sol[:, 1:, :]                                          # (B, S, L)

    # Fold M, the bias and the scale into the weights (Y*alpha == beta since
    # y in {+-1}); tiny ops on the solver output.
    w = scale[0] * jnp.einsum('wl,bsl->wsb', M_CODE, beta)        # (L, S, B)
    wb = (scale[0] * jnp.einsum('wl,bl->wb', M_CODE, bias))[None]  # (1, L, B)

    def pad_lane(x):
        return jnp.pad(x, [(0, 0)] * (x.ndim - 1) + [(0, Bp - B)]) if Bp > B else x

    # Pallas kernel 2: lane-parallel score contraction with folded bias/scale.
    out = logits_head(compat_t, pad_lane(w), pad_lane(wb), TB=TB, vmem_limit=limit)
    return jnp.transpose(out[:, :, :B], (2, 0, 1))                # (B, Q, n_way)


class ClassificationHeadPallas:
    """JAX/Pallas port of ClassificationHead(base_learner='LSSVM')."""

    def __init__(self, base_learner='LSSVM', enable_scale=True):
        assert 'LSSVM' in base_learner, "only the LS_SVM head is implemented"
        self.enable_scale = enable_scale
        # nn.Parameter(torch.FloatTensor([1.0])), deterministic init
        self.scale = jnp.array([1.0], dtype=jnp.float32)

    def __call__(self, query, support, support_labels, n_way, n_shot, **kwargs):
        scale = self.scale if self.enable_scale else jnp.ones((1,), jnp.float32)
        return ls_svm_head(query, support, support_labels, scale,
                           n_way=n_way, n_shot=n_shot, **kwargs)


# --------------------------------- pure-JAX reference ----------------------------------
def _block_diag(m):
    # m: (B, n, p, q) -> (B, n*p, n*q) block-diagonal (mirrors the torch helper)
    Bn, n, p, q = m.shape
    eye = jnp.eye(n, dtype=m.dtype).reshape(1, n, 1, n, 1)
    return (m[:, :, :, None, :] * eye).reshape(Bn, n * p, n * q)


def ls_svm_reference(query, support, labels, n_way, n_shot, scale, C_reg=0.1):
    hp = jax.lax.Precision.HIGHEST
    M_CODE = _m_code()
    B, Q, d = query.shape
    S = support.shape[1]
    one_hot = jax.nn.one_hot(labels.reshape(-1), n_way, dtype=jnp.float32)
    Y = (one_hot @ M_CODE).reshape(B, S, L).transpose(0, 2, 1)
    inp = (support[:, None, :, :] * Y[:, :, :, None]).reshape(B * L, S, d)
    G = jnp.einsum('bnd,bmd->bnm', inp, inp, precision=hp) \
        + C_reg * jnp.eye(S, dtype=jnp.float32)
    Gbd = _block_diag(G.reshape(B, L, S, S))
    Ybd = _block_diag(Y[:, :, None, :])
    Zeros = jnp.broadcast_to(-2.0 * jnp.eye(L, dtype=jnp.float32), (B, L, L))
    top = jnp.concatenate([Zeros, Ybd], 2)
    bot = jnp.concatenate([jnp.transpose(Ybd, (0, 2, 1)), Gbd], 2)
    Mat = jnp.concatenate([top, bot], 1)
    rhs = jnp.concatenate([jnp.zeros((L,), jnp.float32),
                           jnp.ones((L * S,), jnp.float32)])
    solver = jnp.linalg.solve(
        Mat, jnp.broadcast_to(rhs[None, :, None], (B, L * (S + 1), 1)))[..., 0]
    compat = jnp.einsum('bsd,bqd->bsq', support, query, precision=hp)
    bias = solver[:, :L][:, :, None]
    alpha = solver[:, L:].reshape(B, L, S)
    logits = jnp.einsum('bls,bsq->blq', Y * alpha, compat, precision=hp) + bias
    logits = jnp.einsum('wl,blq->bwq', M_CODE, logits, precision=hp)
    return scale[0] * jnp.transpose(logits, (0, 2, 1))


if __name__ == "__main__":
    head = ClassificationHeadPallas('LSSVM', enable_scale=True)

    configs = [
        # (B, n_way, n_shot, n_query, d, tb_cap)
        (2, 5, 1, 6, 16, None),
        (5, 5, 2, 7, 16, None),
        (130, 5, 2, 7, 16, 128),   # tb_cap=128 forces a multi-block (2-step) grid
    ]
    key = jax.random.PRNGKey(0)
    for (B, n_way, n_shot, Q, d, tb_cap) in configs:
        S = n_way * n_shot
        key, kq, ks = jax.random.split(key, 3)
        query = jax.random.normal(kq, (B, Q, d), jnp.float32)
        support = jax.random.normal(ks, (B, S, d), jnp.float32)
        support_labels = jnp.tile(jnp.arange(n_way, dtype=jnp.int32),
                                  (B, n_shot))                      # (B, S)

        logits = head(query, support, support_labels, n_way, n_shot, tb_cap=tb_cap)
        logits = jax.block_until_ready(logits)
        assert logits.shape == (B, Q, n_way), logits.shape
        assert bool(jnp.all(jnp.isfinite(logits)))

        ref = ls_svm_reference(query, support, support_labels, n_way, n_shot,
                               head.scale)
        ref = jax.block_until_ready(ref)
        # All in-kernel contractions are exact f32 on the VPU; remaining headroom
        # is only for f32 LU rounding differences between the collapsed
        # (S+1)-sized solve and the reference's full L*(S+1) KKT solve.
        err = float(jnp.max(jnp.abs(logits - ref)))
        assert bool(jnp.allclose(logits, ref, rtol=1e-3, atol=3e-3)), err

    print("KERNEL_OK")
</pallas_src>

<mosaic_0001>
module attributes {stable_mosaic.version = 11 : i64} {
  func.func @_gram_kernel(%arg0: i32, %arg1: memref<5x16x128xf32, #tpu.memory_space<vmem>>, %arg2: memref<6x16x128xf32, #tpu.memory_space<vmem>>, %arg3: memref<5x5x128xf32, #tpu.memory_space<vmem>>, %arg4: memref<6x5x128xf32, #tpu.memory_space<vmem>>) attributes {dimension_semantics = [#tpu.dimension_semantics<parallel>], iteration_bounds = array<i64: 1>, scalar_prefetch = 0 : i64, scratch_operands = 0 : i64, tpu.core_type = #tpu.core_type<tc>, window_params = [{transform_indices = @transform_0, window_bounds = array<i64: 5, 16, 128>}, {transform_indices = @transform_1, window_bounds = array<i64: 6, 16, 128>}, {transform_indices = @transform_2, window_bounds = array<i64: 5, 5, 128>}, {transform_indices = @transform_3, window_bounds = array<i64: 6, 5, 128>}]} {
    %c0 = arith.constant 0 : index
    %c0_0 = arith.constant 0 : index
    %c0_1 = arith.constant 0 : index
    %0 = vector.load %arg1[%c0, %c0_0, %c0_1] : memref<5x16x128xf32, #tpu.memory_space<vmem>>, vector<5x16x128xf32>
    %c0_2 = arith.constant 0 : index
    %c0_3 = arith.constant 0 : index
    %c0_4 = arith.constant 0 : index
    %1 = vector.load %arg2[%c0_2, %c0_3, %c0_4] : memref<6x16x128xf32, #tpu.memory_space<vmem>>, vector<6x16x128xf32>
    %2 = vector.shape_cast %0 : vector<5x16x128xf32> to vector<5x1x16x128xf32>
    %3 = vector.shape_cast %0 : vector<5x16x128xf32> to vector<1x5x16x128xf32>
    %4 = vector.broadcast %2 : vector<5x1x16x128xf32> to vector<5x5x16x128xf32>
    %5 = vector.broadcast %3 : vector<1x5x16x128xf32> to vector<5x5x16x128xf32>
    %6 = arith.mulf %4, %5 : vector<5x5x16x128xf32>
    %cst = arith.constant dense<0.000000e+00> : vector<5x5x128xf32>
    %7 = vector.multi_reduction <add>, %6, %cst [2] : vector<5x5x16x128xf32> to vector<5x5x128xf32>
    %8 = tpu.iota {dimensions = array<i32: 0>} : vector<5x5x128xi32>
    %9 = tpu.iota {dimensions = array<i32: 1>} : vector<5x5x128xi32>
    %10 = arith.cmpi eq, %8, %9 : vector<5x5x128xi32>
    %cst_5 = arith.constant 1.000000e-01 : f32
    %cst_6 = arith.constant 0.000000e+00 : f32
    %11 = vector.broadcast %cst_5 : f32 to vector<5x5x128xf32>
    %12 = vector.broadcast %cst_6 : f32 to vector<5x5x128xf32>
    %13 = arith.select %10, %11, %12 : vector<5x5x128xi1>, vector<5x5x128xf32>
    %14 = arith.addf %7, %13 : vector<5x5x128xf32>
    %c0_7 = arith.constant 0 : index
    %c0_8 = arith.constant 0 : index
    %c0_9 = arith.constant 0 : index
    %15 = vector.load %arg3[%c0_7, %c0_8, %c0_9] : memref<5x5x128xf32, #tpu.memory_space<vmem>>, vector<5x5x128xf32>
    tpu.vector_store %arg3[%c0_7, %c0_8, %c0_9], %14 {strides = array<i32>} : memref<5x5x128xf32, #tpu.memory_space<vmem>>, vector<5x5x128xf32>,
    %16 = vector.shape_cast %1 : vector<6x16x128xf32> to vector<6x1x16x128xf32>
    %17 = vector.shape_cast %0 : vector<5x16x128xf32> to vector<1x5x16x128xf32>
    %18 = vector.broadcast %16 : vector<6x1x16x128xf32> to vector<6x5x16x128xf32>
    %19 = vector.broadcast %17 : vector<1x5x16x128xf32> to vector<6x5x16x128xf32>
    %20 = arith.mulf %18, %19 : vector<6x5x16x128xf32>
    %cst_10 = arith.constant dense<0.000000e+00> : vector<6x5x128xf32>
    %21 = vector.multi_reduction <add>, %20, %cst_10 [2] : vector<6x5x16x128xf32> to vector<6x5x128xf32>
    %c0_11 = arith.constant 0 : index
    %c0_12 = arith.constant 0 : index
    %c0_13 = arith.constant 0 : index
    %22 = vector.load %arg4[%c0_11, %c0_12, %c0_13] : memref<6x5x128xf32, #tpu.memory_space<vmem>>, vector<6x5x128xf32>
    tpu.vector_store %arg4[%c0_11, %c0_12, %c0_13], %21 {strides = array<i32>} : memref<6x5x128xf32, #tpu.memory_space<vmem>>, vector<6x5x128xf32>,
    return
  }
  func.func @transform_0(%arg0: i32) -> (i32, i32, i32) {
    %c0_i32 = arith.constant 0 : i32
    %c0_i32_0 = arith.constant 0 : i32
    %c0_i32_1 = arith.constant 0 : i32
    return %c0_i32, %c0_i32_0, %arg0 : i32, i32, i32
  }
  func.func @transform_1(%arg0: i32) -> (i32, i32, i32) {
    %c0_i32 = arith.constant 0 : i32
    %c0_i32_0 = arith.constant 0 : i32
    %c0_i32_1 = arith.constant 0 : i32
    return %c0_i32, %c0_i32_0, %arg0 : i32, i32, i32
  }
  func.func @transform_2(%arg0: i32) -> (i32, i32, i32) {
    %c0_i32 = arith.constant 0 : i32
    %c0_i32_0 = arith.constant 0 : i32
    %c0_i32_1 = arith.constant 0 : i32
    return %c0_i32, %c0_i32_0, %arg0 : i32, i32, i32
  }
  func.func @transform_3(%arg0: i32) -> (i32, i32, i32) {
    %c0_i32 = arith.constant 0 : i32
    %c0_i32_0 = arith.constant 0 : i32
    %c0_i32_1 = arith.constant 0 : i32
    return %c0_i32, %c0_i32_0, %arg0 : i32, i32, i32
  }
}

module attributes {stable_mosaic.version = 11 : i64} {
  func.func @_logits_kernel(%arg0: i32, %arg1: memref<6x5x128xf32, #tpu.memory_space<vmem>>, %arg2: memref<5x5x128xf32, #tpu.memory_space<vmem>>, %arg3: memref<1x5x128xf32, #tpu.memory_space<vmem>>, %arg4: memref<6x5x128xf32, #tpu.memory_space<vmem>>) attributes {dimension_semantics = [#tpu.dimension_semantics<parallel>], iteration_bounds = array<i64: 1>, scalar_prefetch = 0 : i64, scratch_operands = 0 : i64, tpu.core_type = #tpu.core_type<tc>, window_params = [{transform_indices = @transform_0, window_bounds = array<i64: 6, 5, 128>}, {transform_indices = @transform_1, window_bounds = array<i64: 5, 5, 128>}, {transform_indices = @transform_2, window_bounds = array<i64: 1, 5, 128>}, {transform_indices = @transform_3, window_bounds = array<i64: 6, 5, 128>}]} {
    %c0 = arith.constant 0 : index
    %c0_0 = arith.constant 0 : index
    %c0_1 = arith.constant 0 : index
    %0 = vector.load %arg1[%c0, %c0_0, %c0_1] : memref<6x5x128xf32, #tpu.memory_space<vmem>>, vector<6x5x128xf32>
    %c0_2 = arith.constant 0 : index
    %c0_3 = arith.constant 0 : index
    %c0_4 = arith.constant 0 : index
    %1 = vector.load %arg2[%c0_2, %c0_3, %c0_4] : memref<5x5x128xf32, #tpu.memory_space<vmem>>, vector<5x5x128xf32>
    %2 = vector.shape_cast %0 : vector<6x5x128xf32> to vector<6x1x5x128xf32>
    %3 = vector.shape_cast %1 : vector<5x5x128xf32> to vector<1x5x5x128xf32>
    %4 = vector.broadcast %2 : vector<6x1x5x128xf32> to vector<6x5x5x128xf32>
    %5 = vector.broadcast %3 : vector<1x5x5x128xf32> to vector<6x5x5x128xf32>
    %6 = arith.mulf %4, %5 : vector<6x5x5x128xf32>
    %cst = arith.constant dense<0.000000e+00> : vector<6x5x128xf32>
    %7 = vector.multi_reduction <add>, %6, %cst [2] : vector<6x5x5x128xf32> to vector<6x5x128xf32>
    %c0_5 = arith.constant 0 : index
    %c0_6 = arith.constant 0 : index
    %c0_7 = arith.constant 0 : index
    %8 = vector.load %arg3[%c0_5, %c0_6, %c0_7] : memref<1x5x128xf32, #tpu.memory_space<vmem>>, vector<1x5x128xf32>
    %9 = vector.broadcast %8 : vector<1x5x128xf32> to vector<6x5x128xf32>
    %10 = arith.addf %7, %9 : vector<6x5x128xf32>
    %c0_8 = arith.constant 0 : index
    %c0_9 = arith.constant 0 : index
    %c0_10 = arith.constant 0 : index
    %11 = vector.load %arg4[%c0_8, %c0_9, %c0_10] : memref<6x5x128xf32, #tpu.memory_space<vmem>>, vector<6x5x128xf32>
    tpu.vector_store %arg4[%c0_8, %c0_9, %c0_10], %10 {strides = array<i32>} : memref<6x5x128xf32, #tpu.memory_space<vmem>>, vector<6x5x128xf32>,
    return
  }
  func.func @transform_0(%arg0: i32) -> (i32, i32, i32) {
    %c0_i32 = arith.constant 0 : i32
    %c0_i32_0 = arith.constant 0 : i32
    %c0_i32_1 = arith.constant 0 : i32
    return %c0_i32, %c0_i32_0, %arg0 : i32, i32, i32
  }
  func.func @transform_1(%arg0: i32) -> (i32, i32, i32) {
    %c0_i32 = arith.constant 0 : i32
    %c0_i32_0 = arith.constant 0 : i32
    %c0_i32_1 = arith.constant 0 : i32
    return %c0_i32, %c0_i32_0, %arg0 : i32, i32, i32
  }
  func.func @transform_2(%arg0: i32) -> (i32, i32, i32) {
    %c0_i32 = arith.constant 0 : i32
    %c0_i32_0 = arith.constant 0 : i32
    %c0_i32_1 = arith.constant 0 : i32
    return %c0_i32, %c0_i32_0, %arg0 : i32, i32, i32
  }
  func.func @transform_3(%arg0: i32) -> (i32, i32, i32) {
    %c0_i32 = arith.constant 0 : i32
    %c0_i32_0 = arith.constant 0 : i32
    %c0_i32_1 = arith.constant 0 : i32
    return %c0_i32, %c0_i32_0, %arg0 : i32, i32, i32
  }
}

</mosaic_0001>

<bundles_post_ra>
// kernel: custom-call.8
= control target key start
LH: loop header
LB: loop body
LE: loop exit
PB: predicated region body
PF: predicated region fallthrough
CT: control target
= control target key end

     0   :  { %5 = vsyncpa [#allocation4], 0  ;;  %s889_s0 = inlined_call_operand.vmem [shape: f32[2,6,6], index: 0, kind: input, shape index: {}]   ;;  %s890_s1 = inlined_call_operand.vmem [shape: f32[2,6,6], index: 1, kind: output, shape index: {0}]   ;;  %s891_s2 = inlined_call_operand.hbm [shape: s32[2,6], index: 2, kind: output, shape index: {1}]   ;;  %s892_s3 = inlined_call_operand.vmem [shape: s32[2,6], index: 3, kind: output, shape index: {2}]  }
   0x1   :  { %7 = vsyncpa [#allocation4 + $0x1], 0  ;;  %s707_s12 = smov 0   ;;  %s709_s13 = smov 0  }
   0x2   :  { %s711_s14 = smov 0   ;;  %s713_s15 = smov 0  }
   0x3 LB: > { %s728_s16 = sadd.s32 4294967295, %s679_s15   ;;  %s542_s17 = sadd.s32 4294967294, %s679_s15   ;;  %s679_s15 = sphi %s713_s15, %s900_s15   ;;  %s675_s14 = sphi %s711_s14, %s899_s14   ;;  %s671_s13 = sphi %s709_s13, %s898_s13   ;;  %s667_s12 = sphi %s707_s12, %s897_s12  }
   0x4   : > { %s732_s18 = sadd.s32 1, %s679_s15   ;;  %s17_s19 = sshrl.u32 %s679_s15, 3 }
   0x5   : > { %s18_s20 = sshrl.u32 %s732_s18, 3  ;;  %s22_s21 = sadd.s32 1, %s675_s14 }
   0x6   : > { %s19_s22 = ssub.s32 %s17_s19, %s18_s20  ;;  %p32_p0 = scmp.ne.s32.totalorder %s675_s14, %s671_s13 }
   0x7   : > { %p20_p1 = scmp.eq.s32.totalorder %s19_s22, 0  ;;  %p33_p2 = scmp.eq.s32.totalorder %s728_s16, 1 }
   0x8   : > { %p38_p3 = scmp.ne.s32.totalorder %s671_s13, %s667_s12  ;;  %p39_p4 = scmp.eq.s32.totalorder %s542_s17, 1 }
   0x9   : > { %s743_s23 = scalar_select %p20_p1, %s675_s14, %s22_s21  }
   0xa   : > { %p745_p5 = por %p33_p2, %p32_p0  ;;  %p749_p6 = por %p39_p4, %p38_p3 }
   0xb   : > { %p544_p7 = scmp.ge.s32.totalorder %s679_s15, 2 }
   0xc   : > { %s85_s26 = sand.u32 (!%p544_p7), 1, %s679_s15   ;;  %s546_s27 = sshll.u32 (!%p544_p7), %s679_s15, 3 }
   0xd   : > { %83 = sbr.rel (%p544_p7) target bundleno = 20 (0x14), region = 16  ;;  %s545_s28 = sshll.u32 (!%p544_p7), %s85_s26, 3 }
   0xe   : > { %s89_s4 = scalar_lea.vmem (!%p544_p7), %s889_s0, %s546_s27  ;;  %s87_s5 = scalar_lea.vmem (!%p544_p7), [#allocation0], %s545_s28 }
   0xf   : > { %v117_v0 = vld [vmem:[%s89_s4] sm:$0xff] (!%p544_p7) }
  0x10   : > { %118 = vst [vmem:[%s87_s5] sm:$0xff] (!%p544_p7), %v117_v0 }
  0x14 PF: > { %p547_p8 = scmp.ge.s32.totalorder %s679_s15, 1  ;;  %p123_p9 = scmp.lt.s32.totalorder %s679_s15, 3 }
  0x16   : > { %p124_p10 = pnand %p547_p8, %p123_p9 }
  0x18   : > { %127 = sbr.rel (%p124_p10) target bundleno = 441 (0x1b9), region = 54 }
  0x1f   : > { %s130_s6 = sand.u32 1, %s728_s16   ;;  %s145_s7 = sand.u32 1, %s671_s13   ;;  %v163_v1 = vlaneseq  ;;  %v685_v4 = vmov 0  }
  0x20   : > { %s548_s8 = sshll.u32 %s130_s6, 3  ;;  %s767_s9 = sshll.u32 %s145_s7, 1 }
  0x21   : > { %v770_v2 = vshrl.u32 %v163_v1, 7  ;;  %s132_s10 = scalar_lea.vmem [#allocation0], %s548_s8  ;;  %s772_s11 = scalar_lea.vmem [#allocation1], %s548_s8 }
  0x22   : > { %v156_v3 = vld [vmem:[%s132_s10] sm:$0xff]  ;;  %s158_s17 = sand.u32 7, %s728_s16   ;;  %s147_s20 = scalar_lea.vmem [#allocation3], %s767_s9 }
  0x23   : > { %157 = vst [vmem:[%s772_s11] sm:$0xff] %v156_v3  ;;  %167 = vst [vmem:[#allocation7] sm:$0xff] %v770_v2  ;;  %s777_s19 = scalar_lea.vmem [#allocation2], %s158_s17  ;;  %s153_s21 = scalar_lea.vmem [#allocation6], %s767_s9 }
  0x24   : > { %162 = vst [vmem:[%s777_s19] sm:$0x1] %v685_v4  ;;  %s782_s22 = scalar_lea.vmem [#allocation5], %s158_s17  ;;  %s784_s26 = smov 0  }
  0x25 LB: >> { %vm183_vm0 = vcmp.lt.s32.totalorder %v770_v2, 6  ;;  %v792_v7 = vstv %s683_s26  ;;  %s224_s27 = ssub.s32 128, %s683_s26  ;;  %v230_v37 = vand.u32 127, %v163_v1  ;;  %s236_s28 = scalar_lea.vmem %s772_s11, %s683_s26 [#allocation1]  ;;  %s683_s26 = sphi %s784_s26, %s173_s26  }
  0x26   : >> { %vm182_vm1 = vcmp.ge.s32.totalorder %v770_v2, %v792_v7  ;;  %s242_s30 = scalar_lea.vmem [#allocation7], %s683_s26  ;;  %vm262_vm15 = vcmp.gt.s32.totalorder %v770_v2, %v792_v7  ;;  %s173_s26 = sadd.s32 1, %s683_s26  }
  0x27   : >> { %vm184_vm3 = vmand %vm182_vm1, %vm183_vm0  ;;  %vm254_vm12 = vcmp.gt.s32.totalorder %v230_v37, %v792_v7  ;;  %vm231_vm13 = vcmp.eq.s32.totalorder %v230_v37, %v792_v7  ;;  %p170_p11 = scmp.ge.s32.totalorder %s173_s26, 6  }
  0x28   : >> { %vm266_vm1 = vmand %vm262_vm15, %vm231_vm13  ;;  %s893_s6 = sshrl.u32 (%p170_p11), %s728_s16, 3  ;;  %s556_s8 = sshll.u32 (%p170_p11), %s728_s16, 3 }
  0x29   : > { %s557_s10 = sshll.u32 (%p170_p11), %s893_s6, 5  ;;  %s686_s6 = smov (%p170_p11), [#allocation3]  }
  0x2a   : >> { %v178_v5 = vld [vmem:[%s772_s11] sm:$0xff]  ;;  %v238_v40 = vld [vmem:[%s236_s28] ss:$0 sm:$0xff]  ;;  %s617_s17 = sshll.u32 (%p170_p11), %s686_s6, 4  ;;  %s618_s17 = int_to_ptr.vmem [resolvable:$false] %s617_s17 }
  0x2b   : >> { %v179_v6 = vand.u32 2147483647, %v178_v5  ;;  %v233_v39 = vld [vmem:[%s777_s19] ss:$0 sm:$0xff] }
  0x2c   : >> { %v244_v41 = vld [vmem:[%s242_s30] ss:$0 sm:$0xff] }
  0x2d   : >> { %vm552_vm2 = vcmp.gt.f32.partialorder %v179_v6, -inf }
  0x2e   : >> { %vm186_vm4 = vmand %vm184_vm3, %vm552_vm2 }
  0x2f   : >> { %v187_v8 = vsel %vm186_vm4, %v770_v2, %v792_v7  ;;  %v188_v9 = vsel %vm186_vm4, %v179_v6, -inf }
  0x30   : >> { %v189_v10 = vrot.slane %v188_v9, 1  ;;  %v190_v11 = vrot.slane %v187_v8, 1 }
  0x32   : >> { %vm191_vm5 = vcmp.ge.f32.partialorder %v189_v10, %v188_v9  ;;  %v194_v12 = vrot.slane %v189_v10, 1  ;;  %v195_v13 = vrot.slane %v190_v11, 1 }
  0x33   : >> { %v192_v14 = vsel %vm191_vm5, %v189_v10, %v188_v9  ;;  %v193_v15 = vsel %vm191_vm5, %v190_v11, %v187_v8 }
  0x34   : >> { %vm196_vm6 = vcmp.ge.f32.partialorder %v194_v12, %v192_v14  ;;  %v199_v16 = vrot.slane %v194_v12, 1  ;;  %v200_v17 = vrot.slane %v195_v13, 1 }
  0x35   : >> { %v197_v18 = vsel %vm196_vm6, %v194_v12, %v192_v14  ;;  %v198_v19 = vsel %vm196_vm6, %v195_v13, %v193_v15 }
  0x36   : >> { %vm201_vm7 = vcmp.ge.f32.partialorder %v199_v16, %v197_v18  ;;  %v204_v20 = vrot.slane %v199_v16, 1  ;;  %v205_v21 = vrot.slane %v200_v17, 1 }
  0x37   : >> { %v202_v22 = vsel %vm201_vm7, %v199_v16, %v197_v18  ;;  %v203_v23 = vsel %vm201_vm7, %v200_v17, %v198_v19 }
  0x38   : >> { %vm206_vm8 = vcmp.ge.f32.partialorder %v204_v20, %v202_v22  ;;  %v209_v24 = vrot.slane %v204_v20, 1  ;;  %v210_v25 = vrot.slane %v205_v21, 1 }
  0x39   : >> { %v207_v26 = vsel %vm206_vm8, %v204_v20, %v202_v22  ;;  %v208_v27 = vsel %vm206_vm8, %v205_v21, %v203_v23 }
  0x3a   : >> { %vm211_vm9 = vcmp.ge.f32.partialorder %v209_v24, %v207_v26  ;;  %v214_v28 = vrot.slane %v209_v24, 1  ;;  %v215_v29 = vrot.slane %v210_v25, 1 }
  0x3b   : >> { %v212_v30 = vsel %vm211_vm9, %v209_v24, %v207_v26  ;;  %v213_v31 = vsel %vm211_vm9, %v210_v25, %v208_v27 }
  0x3c   : >> { %vm216_vm10 = vcmp.ge.f32.partialorder %v214_v28, %v212_v30  ;;  %v219_v32 = vrot.slane %v214_v28, 1  ;;  %v220_v33 = vrot.slane %v215_v29, 1 }
  0x3d   : >> { %v217_v34 = vsel %vm216_vm10, %v214_v28, %v212_v30  ;;  %v218_v35 = vsel %vm216_vm10, %v215_v29, %v213_v31 }
  0x3e   : >> { %vm221_vm11 = vcmp.ge.f32.partialorder %v219_v32, %v217_v34 }
  0x3f   : >> { %v223_v36 = vsel %vm221_vm11, %v220_v33, %v218_v35 }
  0x40   : >> { %225 = vrot.lane.b32.xlu0 %v223_v36, %s224_s27 }
  0xb2   : >> { %v226_v38 = vpop.permute.xlu0 %225 }
  0xb3   : >> { %561 = vpush %v226_v38 }
  0xe4   : >> { %s562_s29 = spop %561 }
  0xe5   : >> { %v232_v42 = vstv %s562_s29  ;;  %s237_s4 = scalar_lea.vmem %s772_s11, %s562_s29 [#allocation1]  ;;  %s243_s5 = scalar_lea.vmem [#allocation7], %s562_s29 }
  0xe6   : >> { %v239_v43 = vld [vmem:[%s237_s4] ss:$0 sm:$0xff]  ;;  %v234_v45 = vsel %vm231_vm13, %v232_v42, %v233_v39  ;;  %s836_s29 = scalar_lea.hbm (%p170_p11), %s891_s2, %s557_s10 }
  0xe7   : >> { %v245_v44 = vld [vmem:[%s243_s5] ss:$0 sm:$0xff]  ;;  %240 = vst [vmem:[%s237_s4] sm:$0x1] %v238_v40  ;;  %vm248_vm14 = vcmp.ne.f32.partialorder %v239_v43, 0.0  ;;  %235 = vst [vmem:[%s777_s19] sm:$0x1] %v234_v45  ;;  %v255_v52 = vsel %vm254_vm12, %v239_v43, 0.0  ;;  %s348_s19 = scalar_lea.vmem (%p170_p11), %s890_s1, %s556_s8 }
  0xe8   : >> { %246 = vst [vmem:[%s243_s5] sm:$0x1] %v244_v41  ;;  %241 = vst [vmem:[%s236_s28] sm:$0x1] %v239_v43  ;;  %s339_s4 = scalar_lea.sflag (%p170_p11), [#allocation4], %s145_s7 }
  0xe9   : >> { %247 = vst [vmem:[%s242_s30] sm:$0x1] %v245_v44  ;;  %vm249_vm0 = vmand %vm231_vm13, %vm248_vm14  ;;  %s391_s30 = sshll.u32 (%p170_p11), %s147_s20, 4  ;;  %s392_s30 = int_to_ptr.vmem [resolvable:$true] %s391_s30 }
  0xea   : >> { %v250_v46 = vsel %vm249_vm0, %v239_v43, 1.0  ;;  %s613_s5 = scalar_lea.vmem (%p170_p11), %s392_s30, 32  ;;  %p620_p1 = scmp.lt.s32.totalorder (%p170_p11), %s392_s30, %s618_s17 }
  0xeb   : >> { %v263_v47 = vsel %vm262_vm15, %v250_v46, 1.0  ;;  %p614_p12 = scmp.ne.s32.totalorder (%p170_p11), %s392_s30, %s613_s5 }
  0xec   : >> { %611 = vrcp.f32 %v263_v47 }
  0xed   : > { %p615_p13 = pnand (%p170_p11), %p614_p12, %p745_p5 }
  0xee   : > { %v325_v57 = vld [vmem:[#allocation2] sm:$0x3] (%p170_p11) }
  0xef   : >> { %v259_v49 = vld [vmem:[%s772_s11] sm:$0xff]  ;;  %327 = vst [vmem:[%s147_s20] sm:$0x3] (%p170_p11), %v325_v57  ;;  %p616_p0 = pneg (%p170_p11), %p615_p13 }
  0xf0   : > { %v273_v56 = vld [vmem:[#allocation7] sm:$0xff] (%p170_p11) }
  0xf6   : >> { %v612_v48 = vpop.eup %611 }
  0xf7   : >> { %v265_v50 = vmul.f32 %v612_v48, %v259_v49 }
  0xf9   : >> { %v267_v51 = vsel %vm266_vm1, %v265_v50, 0.0 }
  0xfa   : >> { %268 = vadd.xlane.f32.xlu0 %v267_v51 }
 0x127   : > { %289 = vxpose.xlu0.b32.start.end [1/1] (short) (narrow) (%p170_p11), %v273_v56, 8 }
 0x186   : > { %172 = sbr.rel (!%p170_p11) target bundleno = 37 (0x25), region = 210 }
 0x187   : >> { %v269_v53 = vpop.xlane.xlu0 %268 }
 0x188   : >> { %v270_v54 = vmul.f32 %v269_v53, %v255_v52 }
 0x18a   : >> { %v271_v55 = vsub.f32 %v265_v50, %v270_v54 }
 0x18c   : >> { %272 = vst [vmem:[%s772_s11] sm:$0xff] %v271_v55 }
 0x193   : > { %v376_v58 = vld [vmem:[%s772_s11] sm:$0xff]  ;;  %s619_s11 = scalar_lea.vmem %s618_s17, 64 }
 0x194   : > { %377 = vst [vmem:[%s348_s19] sm:$0xff] %v376_v58  ;;  %p621_p2 = scmp.lt.s32.totalorder %s619_s11, %s613_s5 }
 0x196   : > { %p622_p3 = por %p621_p2, %p620_p1 }
 0x198   : > { %p623_p4 = pnand %p622_p3, %p616_p0 }
 0x19a   : > { %626 = shalt.err (!%p623_p4)
}
 0x19b   : > { %s627_s7 = scalar_lea.hbm %s836_s29, 32  ;;  %s631_s6 = scalar_lea.hbm %s891_s2, 32 }
 0x19c   : > { %p628_p8 = scmp.ne.s32.totalorder %s836_s29, %s627_s7  ;;  %p632_p11 = scmp.lt.u32.totalorder %s836_s29, %s891_s2 }
 0x19d   : > { %p633_p12 = scmp.lt.u32.totalorder %s631_s6, %s627_s7  ;;  %p635_p0 = scmp.lt.u32.totalorder %s627_s7, %s836_s29 }
 0x19e   : > { %p629_p9 = pnand %p628_p8, %p745_p5 }
 0x19f   : > { %p634_p13 = por %p633_p12, %p632_p11 }
 0x1a0   : > { %p630_p10 = pneg %p629_p9 }
 0x1a1   : > { %p636_p1 = por %p635_p0, %p634_p13 }
 0x1a3   : > { %p637_p2 = pnand %p636_p1, %p630_p10 }
 0x1a5   : > { %640 = shalt.err (!%p637_p2)
}
 0x1a6   : > { %563 = dma.vmem_to_hbm [thread:$0]  (%p745_p5), %s392_s30, 32, %s836_s29, %s339_s4  }
 0x1a7   : > { %v305_v59 = vpop.trf.xlu0  ;;  %s896_s19 = sshrl.u32 (%p745_p5), %s728_s16, 3 }
 0x1a8   : > { %321 = vst [vmem:[%s782_s22] sm:$0x1] %v305_v59  ;;  %s558_s27 = sshll.u32 (%p745_p5), %s896_s19, 1 }
 0x1a9   : > { %s400_s17 = scalar_lea.vmem (%p745_p5), %s892_s3, %s558_s27 }
 0x1aa   : > { %397 = sbr.rel (!%p745_p5) target bundleno = 441 (0x1b9), region = 104 }
 0x1af   : > { %v331_v60 = vld [vmem:[#allocation5] sm:$0x3] }
 0x1b0   : > { %333 = vst [vmem:[%s153_s21] sm:$0x3] %v331_v60 }
 0x1b7   : > { %v416_v61 = vld [vmem:[%s153_s21] sm:$0x3] }
 0x1b8   : > { %417 = vst [vmem:[%s400_s17] sm:$0x3] %v416_v61 }
 0x1b9 PF: > { %s444_s22 = sand.u32 1, %s667_s12   ;;  %p566_p5 = pnand %p544_p7, %p749_p6 }
 0x1ba   : > { %s445_s24 = scalar_lea.sflag [#allocation4], %s444_s22 }
 0x1bb   : > { %662 = dma.done.wait (!%p566_p5), %s445_s24, 32  }
 0x1bc   : > { %664 = vsyncadd (!%p566_p5), %s445_s24, 4294967264  ;;  %p10_p3 = scmp.ge.s32.totalorder %s732_s18, 4   ;;  %s897_s12 = smov %s671_s13 }
 0x1bd   : > { %s898_s13 = smov %s675_s14  ;;  %s899_s14 = smov %s743_s23 }
 0x1be   : > { %s900_s15 = smov %s732_s18  ;;  %12 = sbr.rel (!%p10_p3) target bundleno = 3 (0x3), region = 221 }
 0x1c5   :  { %457 = vsyncpa [#allocation4], 1 }
 0x1c6   :  { %459 = vsyncpa [#allocation4 + $0x1], 1 }

// kernel: custom-call.10
= control target key start
LH: loop header
LB: loop body
LE: loop exit
PB: predicated region body
PF: predicated region fallthrough
CT: control target
= control target key end

     0   :  { %s365_s6 = smov 0   ;;  %s367_s7 = smov 0   ;;  %s405_s0 = inlined_call_operand.vmem [shape: f32[2,1,6,6], index: 0, kind: input, shape index: {}]   ;;  %s406_s1 = inlined_call_operand.vmem [shape: f32[2,1,6,6], index: 1, kind: output, shape index: {}]  }
   0x1   :  { %s369_s8 = smov 0  }
   0x2 LB: > { %s291_s9 = sadd.s32 4294967295, %s352_s8   ;;  %s33_s10 = sadd.s32 1, %s348_s7  ;;  %s352_s8 = sphi %s369_s8, %s7_s8   ;;  %s348_s7 = sphi %s367_s7, %s408_s7   ;;  %s344_s6 = sphi %s365_s6, %s407_s6  }
   0x3   : > { %p35_p0 = scmp.ge.s32.totalorder %s33_s10, 2  ;;  %p293_p1 = scmp.ge.s32.totalorder %s352_s8, 2 }
   0x4   : > { %s49_s11 = sand.u32 (!%p293_p1), 1, %s352_s8   ;;  %s295_s12 = sshll.u32 (!%p293_p1), %s348_s7, 3 }
   0x5   : > { %s410_s10 = smov (%p35_p0, %s33_s10), 0  ;;  %47 = sbr.rel (%p293_p1) target bundleno = 12 (0xc), region = 16 }
   0x6   : > { %s294_s13 = sshll.u32 (!%p293_p1), %s49_s11, 3  ;;  %s56_s16 = scalar_lea.vmem (!%p293_p1), %s405_s0, %s295_s12 }
   0x7   : > { %v84_v0 = vld [vmem:[%s56_s16] sm:$0xff] (!%p293_p1)  ;;  %s51_s17 = scalar_lea.vmem (!%p293_p1), [#allocation0], %s294_s13 }
   0x8   : > { %85 = vst [vmem:[%s51_s17] sm:$0xff] (!%p293_p1), %v84_v0 }
   0xc PF: > { %p296_p2 = scmp.ge.s32.totalorder %s352_s8, 1  ;;  %p90_p3 = scmp.lt.s32.totalorder %s352_s8, 3 }
   0xe   : > { %p91_p4 = pnand %p296_p2, %p90_p3 }
  0x10   : > { %94 = sbr.rel (%p91_p4) target bundleno = 923 (0x39b), region = 54 }
  0x17   : > { %s97_s18 = sand.u32 1, %s291_s9   ;;  %v108_v1 = vlaneseq  ;;  %v354_v10 = vmov -1.0   ;;  %s300_s21 = sshll.u32 %s344_s6, 3 }
  0x18   : > { %s297_s19 = sshll.u32 %s97_s18, 3  ;;  %s199_s24 = scalar_lea.vmem %s406_s1, %s300_s21 }
  0x19   : > { %v109_v2 = vand.u32 127, %v108_v1  ;;  %v112_v3 = vshrl.u32 %v108_v1, 7  ;;  %s99_s20 = scalar_lea.vmem [#allocation0], %s297_s19 }
  0x1a   : > { %v115_v4 = vld [vmem:[%s99_s20] sm:$0xff] }
  0x1b   : > { %vm110_vm0 = vcmp.lt.s32.totalorder %v109_v2, 6  ;;  %vm114_vm1 = vcmp.eq.s32.totalorder %v112_v3, %v109_v2  ;;  %vm119_vm2 = vcmp.ge.s32.totalorder %v112_v3, %v109_v2  ;;  %vm133_vm4 = vcmp.eq.s32.totalorder %v109_v2, 0 }
  0x1c   : > { %v116_v5 = vsel %vm114_vm1, %v115_v4, 0.0  ;;  %vm120_vm3 = vmand %vm119_vm2, %vm110_vm0  ;;  %vm130_vm5 = vcmp.eq.s32.totalorder %v109_v2, %v112_v3  ;;  %v134_v11 = vsel %vm133_vm4, 1.0, %v354_v10  ;;  %vm141_vm6 = vcmp.eq.s32.totalorder %v109_v2, 1 }
  0x1d   : > { %v121_v6 = vsel %vm120_vm3, %v115_v4, 0.0  ;;  %117 = vadd.xlane.f32.xlu0 %v116_v5  ;;  %v135_v12 = vsel %vm130_vm5, %v134_v11, 0.0  ;;  %vm151_vm7 = vcmp.eq.s32.totalorder %v109_v2, 2  ;;  %vm161_vm8 = vcmp.eq.s32.totalorder %v109_v2, 3 }
  0x1e   : > { %vm171_vm9 = vcmp.eq.s32.totalorder %v109_v2, 4  ;;  %vm181_vm10 = vcmp.eq.s32.totalorder %v109_v2, 5 }
  0xaa   : > { %v118_v7 = vpop.xlane.xlu0 %117 }
  0xab   : > { %328 = vrcp.f32 %v118_v7  ;;  %vm188_vm11 = vweird.f32 %v118_v7 }
  0xb5   : > { %v329_v8 = vpop.eup %328 }
  0xb6   : > { %v123_v9 = vmul.f32 %v329_v8, %v121_v6 }
  0xb8   : > { %124 = vst [vmem:[#allocation2] sm:$0xff] %v123_v9 }
  0xbf   : > { %v137_v13 = vld [vmem:[#allocation2 + $0x1] ss:$0 sm:$0xff]  ;;  %v147_v16 = vld [vmem:[#allocation2 + $0x2] ss:$0 sm:$0xff]  ;;  %v157_v21 = vld [vmem:[#allocation2 + $0x3] ss:$0 sm:$0xff] }
  0xc0   : > { %v138_v14 = vxor.u32 2147483648, %v137_v13  ;;  %v148_v18 = vxor.u32 2147483648, %v147_v16  ;;  %v158_v23 = vxor.u32 2147483648, %v157_v21  ;;  %v167_v26 = vld [vmem:[#allocation2 + $0x4] ss:$0 sm:$0xff] }
  0xc1   : > { %v168_v28 = vxor.u32 2147483648, %v167_v26  ;;  %v177_v31 = vld [vmem:[#allocation2 + $0x5] ss:$0 sm:$0xff] }
  0xc2   : > { %v142_v15 = vmul.f32 %v138_v14, %v135_v12  ;;  %v178_v33 = vxor.u32 2147483648, %v177_v31 }
  0xc4   : > { %143 = vadd.xlane.f32.xlu0 %v142_v15 }
 0x151   : > { %v144_v17 = vpop.xlane.xlu0 %143 }
 0x152   : > { %v145_v19 = vsel %vm141_vm6, %v144_v17, %v135_v12 }
 0x153   : > { %v152_v20 = vmul.f32 %v148_v18, %v145_v19 }
 0x155   : > { %153 = vadd.xlane.f32.xlu1 %v152_v20 }
 0x1e2   : > { %v154_v22 = vpop.xlane.xlu1 %153 }
 0x1e3   : > { %v155_v24 = vsel %vm151_vm7, %v154_v22, %v145_v19 }
 0x1e4   : > { %v162_v25 = vmul.f32 %v158_v23, %v155_v24 }
 0x1e6   : > { %163 = vadd.xlane.f32.xlu1 %v162_v25 }
 0x273   : > { %v164_v27 = vpop.xlane.xlu1 %163 }
 0x274   : > { %v165_v29 = vsel %vm161_vm8, %v164_v27, %v155_v24 }
 0x275   : > { %v172_v30 = vmul.f32 %v168_v28, %v165_v29 }
 0x277   : > { %173 = vadd.xlane.f32.xlu0 %v172_v30 }
 0x304   : > { %v174_v32 = vpop.xlane.xlu0 %173 }
 0x305   : > { %v175_v34 = vsel %vm171_vm9, %v174_v32, %v165_v29 }
 0x306   : > { %v182_v35 = vmul.f32 %v178_v33, %v175_v34 }
 0x308   : > { %183 = vadd.xlane.f32.xlu1 %v182_v35 }
 0x395   : > { %v184_v36 = vpop.xlane.xlu1 %183 }
 0x396   : > { %v185_v37 = vsel %vm181_vm10, %v184_v36, %v175_v34 }
 0x397   : > { %v187_v38 = vmul.f32 %v329_v8, %v185_v37 }
 0x399   : > { %v189_v39 = vsel %vm188_vm11, %v185_v37, %v187_v38 }
 0x39a   : > { %228 = vst [vmem:[%s199_s24] sm:$0xff] %v189_v39 }
 0x39b PF: > { %s7_s8 = sadd.s32 1, %s352_s8   ;;  %s407_s6 = smov %s348_s7 }
 0x39c   : > { %p4_p5 = scmp.ge.s32.totalorder %s7_s8, 4   ;;  %s408_s7 = smov %s410_s10 }
 0x39e   :  { %6 = sbr.rel (!%p4_p5) target bundleno = 2 (0x2), region = 123 }

// kernel: custom-call.9
= control target key start
LH: loop header
LB: loop body
LE: loop exit
PB: predicated region body
PF: predicated region fallthrough
CT: control target
= control target key end

     0   :  { %s364_s6 = smov 0   ;;  %s366_s7 = smov 0   ;;  %s404_s0 = inlined_call_operand.vmem [shape: f32[2,1,6,6], index: 0, kind: input, shape index: {}]   ;;  %s405_s1 = inlined_call_operand.vmem [shape: f32[2,1,6,6], index: 1, kind: output, shape index: {}]  }
   0x1   :  { %s368_s8 = smov 0  }
   0x2 LB: > { %s290_s9 = sadd.s32 4294967295, %s351_s8   ;;  %s33_s10 = sadd.s32 1, %s347_s7  ;;  %s351_s8 = sphi %s368_s8, %s7_s8   ;;  %s347_s7 = sphi %s366_s7, %s407_s7   ;;  %s343_s6 = sphi %s364_s6, %s406_s6  }
   0x3   : > { %p35_p0 = scmp.ge.s32.totalorder %s33_s10, 2  ;;  %p292_p1 = scmp.ge.s32.totalorder %s351_s8, 2 }
   0x4   : > { %s49_s11 = sand.u32 (!%p292_p1), 1, %s351_s8   ;;  %s294_s12 = sshll.u32 (!%p292_p1), %s347_s7, 3 }
   0x5   : > { %s409_s10 = smov (%p35_p0, %s33_s10), 0  ;;  %47 = sbr.rel (%p292_p1) target bundleno = 12 (0xc), region = 16 }
   0x6   : > { %s293_s13 = sshll.u32 (!%p292_p1), %s49_s11, 3  ;;  %s56_s16 = scalar_lea.vmem (!%p292_p1), %s404_s0, %s294_s12 }
   0x7   : > { %v84_v0 = vld [vmem:[%s56_s16] sm:$0xff] (!%p292_p1)  ;;  %s51_s17 = scalar_lea.vmem (!%p292_p1), [#allocation0], %s293_s13 }
   0x8   : > { %85 = vst [vmem:[%s51_s17] sm:$0xff] (!%p292_p1), %v84_v0 }
   0xc PF: > { %p295_p2 = scmp.ge.s32.totalorder %s351_s8, 1  ;;  %p90_p3 = scmp.lt.s32.totalorder %s351_s8, 3 }
   0xe   : > { %p91_p4 = pnand %p295_p2, %p90_p3 }
  0x10   : > { %94 = sbr.rel (%p91_p4) target bundleno = 923 (0x39b), region = 54 }
  0x17   : > { %s97_s18 = sand.u32 1, %s290_s9   ;;  %v108_v1 = vlaneseq  ;;  %v353_v10 = vmov -1.0   ;;  %s299_s21 = sshll.u32 %s343_s6, 3 }
  0x18   : > { %s296_s19 = sshll.u32 %s97_s18, 3  ;;  %s198_s24 = scalar_lea.vmem %s405_s1, %s299_s21 }
  0x19   : > { %v109_v2 = vand.u32 127, %v108_v1  ;;  %v112_v3 = vshrl.u32 %v108_v1, 7  ;;  %s99_s20 = scalar_lea.vmem [#allocation0], %s296_s19 }
  0x1a   : > { %v115_v4 = vld [vmem:[%s99_s20] sm:$0xff] }
  0x1b   : > { %vm110_vm0 = vcmp.lt.s32.totalorder %v109_v2, 6  ;;  %vm114_vm1 = vcmp.eq.s32.totalorder %v112_v3, %v109_v2  ;;  %vm119_vm2 = vcmp.le.s32.totalorder %v112_v3, %v109_v2  ;;  %vm133_vm4 = vcmp.eq.s32.totalorder %v109_v2, 5 }
  0x1c   : > { %v116_v5 = vsel %vm114_vm1, %v115_v4, 0.0  ;;  %vm120_vm3 = vmand %vm119_vm2, %vm110_vm0  ;;  %vm130_vm5 = vcmp.eq.s32.totalorder %v109_v2, %v112_v3  ;;  %v134_v11 = vsel %vm133_vm4, 1.0, %v353_v10  ;;  %vm141_vm6 = vcmp.eq.s32.totalorder %v109_v2, 4 }
  0x1d   : > { %v121_v6 = vsel %vm120_vm3, %v115_v4, 0.0  ;;  %117 = vadd.xlane.f32.xlu0 %v116_v5  ;;  %v135_v12 = vsel %vm130_vm5, %v134_v11, 0.0  ;;  %vm151_vm7 = vcmp.eq.s32.totalorder %v109_v2, 3  ;;  %vm161_vm8 = vcmp.eq.s32.totalorder %v109_v2, 2 }
  0x1e   : > { %vm171_vm9 = vcmp.eq.s32.totalorder %v109_v2, 1  ;;  %vm180_vm10 = vcmp.eq.s32.totalorder %v109_v2, 0 }
  0xaa   : > { %v118_v7 = vpop.xlane.xlu0 %117 }
  0xab   : > { %327 = vrcp.f32 %v118_v7  ;;  %vm187_vm11 = vweird.f32 %v118_v7 }
  0xb5   : > { %v328_v8 = vpop.eup %327 }
  0xb6   : > { %v123_v9 = vmul.f32 %v328_v8, %v121_v6 }
  0xb8   : > { %124 = vst [vmem:[#allocation2] sm:$0xff] %v123_v9 }
  0xbf   : > { %v137_v13 = vld [vmem:[#allocation2 + $0x4] ss:$0 sm:$0xff]  ;;  %v147_v16 = vld [vmem:[#allocation2 + $0x3] ss:$0 sm:$0xff]  ;;  %v157_v21 = vld [vmem:[#allocation2 + $0x2] ss:$0 sm:$0xff] }
  0xc0   : > { %v138_v14 = vxor.u32 2147483648, %v137_v13  ;;  %v148_v18 = vxor.u32 2147483648, %v147_v16  ;;  %v158_v23 = vxor.u32 2147483648, %v157_v21  ;;  %v167_v26 = vld [vmem:[#allocation2 + $0x1] ss:$0 sm:$0xff] }
  0xc1   : > { %v168_v28 = vxor.u32 2147483648, %v167_v26  ;;  %v176_v31 = vld [vmem:[#allocation2] ss:$0 sm:$0xff] }
  0xc2   : > { %v142_v15 = vmul.f32 %v138_v14, %v135_v12  ;;  %v177_v33 = vxor.u32 2147483648, %v176_v31 }
  0xc4   : > { %143 = vadd.xlane.f32.xlu0 %v142_v15 }
 0x151   : > { %v144_v17 = vpop.xlane.xlu0 %143 }
 0x152   : > { %v145_v19 = vsel %vm141_vm6, %v144_v17, %v135_v12 }
 0x153   : > { %v152_v20 = vmul.f32 %v148_v18, %v145_v19 }
 0x155   : > { %153 = vadd.xlane.f32.xlu1 %v152_v20 }
 0x1e2   : > { %v154_v22 = vpop.xlane.xlu1 %153 }
 0x1e3   : > { %v155_v24 = vsel %vm151_vm7, %v154_v22, %v145_v19 }
 0x1e4   : > { %v162_v25 = vmul.f32 %v158_v23, %v155_v24 }
 0x1e6   : > { %163 = vadd.xlane.f32.xlu1 %v162_v25 }
 0x273   : > { %v164_v27 = vpop.xlane.xlu1 %163 }
 0x274   : > { %v165_v29 = vsel %vm161_vm8, %v164_v27, %v155_v24 }
 0x275   : > { %v172_v30 = vmul.f32 %v168_v28, %v165_v29 }
 0x277   : > { %173 = vadd.xlane.f32.xlu0 %v172_v30 }
 0x304   : > { %v174_v32 = vpop.xlane.xlu0 %173 }
 0x305   : > { %v175_v34 = vsel %vm171_vm9, %v174_v32, %v165_v29 }
 0x306   : > { %v181_v35 = vmul.f32 %v177_v33, %v175_v34 }
 0x308   : > { %182 = vadd.xlane.f32.xlu1 %v181_v35 }
 0x395   : > { %v183_v36 = vpop.xlane.xlu1 %182 }
 0x396   : > { %v184_v37 = vsel %vm180_vm10, %v183_v36, %v175_v34 }
 0x397   : > { %v186_v38 = vmul.f32 %v328_v8, %v184_v37 }
 0x399   : > { %v188_v39 = vsel %vm187_vm11, %v184_v37, %v186_v38 }
 0x39a   : > { %227 = vst [vmem:[%s198_s24] sm:$0xff] %v188_v39 }
 0x39b PF: > { %s7_s8 = sadd.s32 1, %s351_s8   ;;  %s406_s6 = smov %s347_s7 }
 0x39c   : > { %p4_p5 = scmp.ge.s32.totalorder %s7_s8, 4   ;;  %s407_s7 = smov %s409_s10 }
 0x39e   :  { %6 = sbr.rel (!%p4_p5) target bundleno = 2 (0x2), region = 122 }

// kernel: ls_svm_head.2
= control target key start
LH: loop header
LB: loop body
LE: loop exit
PB: predicated region body
PF: predicated region fallthrough
CT: control target
= control target key end

     0   :  { %v170_v0 = vlaneseq  ;;  %v681_v28 = vmov 0.0   ;;  %vm283_vm2 = vcmask 1041409   ;;  %vm286_vm3 = vcmask 1042434   ;;  %s1032_s0 = inlined_call_operand.vmem [shape: f32[5,16,128], index: 0, kind: input, shape index: {}]   ;;  %s1033_s2 = inlined_call_operand.vmem [shape: f32[5,5,128], index: 2, kind: output, shape index: {0}]   ;;  %s1034_s1 = inlined_call_operand.vmem [shape: f32[6,16,128], index: 1, kind: input, shape index: {}]   ;;  %s1035_s3 = inlined_call_operand.vmem [shape: f32[6,5,128], index: 3, kind: output, shape index: {1}]  }
   0x1   :  { %v705_v1 = vld [vmem:[%s1032_s0] sm:$0xff]  ;;  %v710_v2 = vld [vmem:[%s1032_s0 + $0x8] sm:$0xff]  ;;  %v715_v3 = vld [vmem:[%s1032_s0 + $0x10] sm:$0xff]  ;;  %vm289_vm4 = vcmask 1043459   ;;  %vm292_vm5 = vcmask 1044484  }
   0x2   :  { %v720_v4 = vld [vmem:[%s1032_s0 + $0x18] sm:$0xff]  ;;  %v725_v5 = vld [vmem:[%s1032_s0 + $0x20] sm:$0xff]  ;;  %v730_v6 = vld [vmem:[%s1032_s0 + $0x28] sm:$0xff]  ;;  %v35_v7 = vmul.f32 %v705_v1, %v705_v1  ;;  %v36_v8 = vmul.f32 %v710_v2, %v710_v2  ;;  %v37_v9 = vmul.f32 %v715_v3, %v705_v1  ;;  %v738_v10 = vshrl.u32 %v170_v0, 7 }
   0x3   :  { %v743_v11 = vld [vmem:[%s1032_s0 + $0x30] sm:$0xff]  ;;  %v748_v12 = vld [vmem:[%s1032_s0 + $0x38] sm:$0xff]  ;;  %v753_v13 = vld [vmem:[%s1032_s0 + $0x40] sm:$0xff]  ;;  %v38_v14 = vmul.f32 %v720_v4, %v710_v2  ;;  %v39_v15 = vmul.f32 %v725_v5, %v705_v1  ;;  %v40_v16 = vmul.f32 %v730_v6, %v710_v2  ;;  %v45_v17 = vmul.f32 %v715_v3, %v715_v3 }
   0x4   :  { %v766_v18 = vld [vmem:[%s1032_s0 + $0x48] sm:$0xff]  ;;  %v41_v19 = vmul.f32 %v743_v11, %v705_v1  ;;  %v42_v20 = vmul.f32 %v748_v12, %v710_v2  ;;  %v43_v21 = vmul.f32 %v753_v13, %v705_v1  ;;  %v65_v22 = vadd.f32 %v36_v8, %v35_v7 }
   0x5   :  { %v44_v23 = vmul.f32 %v766_v18, %v710_v2  ;;  %v72_v24 = vadd.f32 %v38_v14, %v37_v9  ;;  %v79_v25 = vadd.f32 %v40_v16, %v39_v15  ;;  %vm172_vm0 = vcmp.eq.s32.totalorder %v738_v10, 0 }
   0x6   :  { %v66_v26 = vrot.slane %v65_v22, 4  ;;  %v86_v27 = vadd.f32 %v42_v20, %v41_v19  ;;  %vm176_vm1 = vcmp.eq.s32.totalorder %v738_v10, 4  ;;  %v177_v29 = vsel %vm172_vm0, 0.1, %v681_v28 }
   0x7   :  { %v73_v30 = vrot.slane %v72_v24, 4  ;;  %v80_v31 = vrot.slane %v79_v25, 4  ;;  %v93_v32 = vadd.f32 %v44_v23, %v43_v21  ;;  %v780_v33 = vsel %vm176_vm1, 0.1, %v681_v28 }
   0x8   :  { %v67_v34 = vadd.f32 %v66_v26, %v65_v22  ;;  %v87_v35 = vrot.slane %v86_v27, 4  ;;  %v187_v36 = vrot.slane %v177_v29, 1  ;;  %v188_v37 = vrot.slane %v177_v29, 2 }
   0x9   :  { %v74_v38 = vadd.f32 %v73_v30, %v72_v24  ;;  %v81_v39 = vadd.f32 %v80_v31, %v79_v25  ;;  %v94_v40 = vrot.slane %v93_v32, 4  ;;  %v189_v41 = vrot.slane %v177_v29, 3 }
   0xa   :  { %v68_v42 = vrot.slane %v67_v34, 2  ;;  %v88_v43 = vadd.f32 %v87_v35, %v86_v27  ;;  %v190_v44 = vrot.slane %v177_v29, 4  ;;  %v46_v45 = vmul.f32 %v720_v4, %v720_v4 }
   0xb   :  { %v75_v46 = vrot.slane %v74_v38, 2  ;;  %v82_v47 = vrot.slane %v81_v39, 2  ;;  %v95_v48 = vadd.f32 %v94_v40, %v93_v32  ;;  %v47_v49 = vmul.f32 %v725_v5, %v715_v3 }
   0xc   :  { %v69_v50 = vadd.f32 %v68_v42, %v67_v34  ;;  %v89_v51 = vrot.slane %v88_v43, 2  ;;  %v48_v52 = vmul.f32 %v730_v6, %v720_v4  ;;  %v49_v53 = vmul.f32 %v743_v11, %v715_v3 }
   0xd   :  { %v76_v54 = vadd.f32 %v75_v46, %v74_v38  ;;  %v83_v55 = vadd.f32 %v82_v47, %v81_v39  ;;  %v96_v56 = vrot.slane %v95_v48, 2  ;;  %v50_v57 = vmul.f32 %v748_v12, %v720_v4 }
   0xe   :  { %v70_v58 = vrot.slane %v69_v50, 1  ;;  %v90_v59 = vadd.f32 %v89_v51, %v88_v43  ;;  %v51_v60 = vmul.f32 %v753_v13, %v715_v3  ;;  %v52_v61 = vmul.f32 %v766_v18, %v720_v4 }
   0xf   :  { %v77_v62 = vrot.slane %v76_v54, 1  ;;  %v84_v63 = vrot.slane %v83_v55, 1  ;;  %v97_v0 = vadd.f32 %v96_v56, %v95_v48  ;;  %v100_v7 = vadd.f32 %v46_v45, %v45_v17 }
  0x10   :  { %v71_v8 = vadd.f32 %v70_v58, %v69_v50  ;;  %v91_v9 = vrot.slane %v90_v59, 1  ;;  %v107_v14 = vadd.f32 %v48_v52, %v47_v49  ;;  %v114_v15 = vadd.f32 %v50_v57, %v49_v53 }
  0x11   :  { %v78_v16 = vadd.f32 %v77_v62, %v76_v54  ;;  %v796_v19 = vadd.f32 %v84_v63, %v83_v55  ;;  %v98_v20 = vrot.slane %v97_v0, 1  ;;  %v101_v21 = vrot.slane %v100_v7, 4 }
  0x12   :  { %v798_v22 = vadd.f32 %v91_v9, %v90_v59  ;;  %v232_v23 = vadd.f32 %v177_v29, %v71_v8  ;;  %v108_v24 = vrot.slane %v107_v14, 4  ;;  %v115_v25 = vrot.slane %v114_v15, 4 }
  0x13   :  { %v99_v26 = vadd.f32 %v98_v20, %v97_v0  ;;  %v233_v27 = vadd.f32 %v187_v36, %v78_v16  ;;  %v234_v30 = vadd.f32 %v188_v37, %v796_v19  ;;  %v102_v31 = vadd.f32 %v101_v21, %v100_v7 }
  0x14   :  { %v235_v17 = vadd.f32 %v189_v41, %v798_v22  ;;  %v109_v32 = vadd.f32 %v108_v24, %v107_v14  ;;  %v116_v34 = vadd.f32 %v115_v25, %v114_v15  ;;  %v121_v35 = vadd.f32 %v52_v61, %v51_v60 }
  0x15   :  { %v236_v38 = vadd.f32 %v190_v44, %v99_v26  ;;  %v803_v39 = vadd.f32 %v780_v33, %v99_v26  ;;  %v282_v40 = vrot.slane %v233_v27, 7  ;;  %v285_v42 = vrot.slane %v234_v30, 6 }
  0x16   :  { %v288_v43 = vrot.slane %v235_v17, 5  ;;  %v103_v29 = vrot.slane %v102_v31, 2  ;;  %v110_v45 = vrot.slane %v109_v32, 2  ;;  %v117_v46 = vrot.slane %v116_v34, 2 }
  0x17   :  { %v284_v36 = vsel %vm283_vm2, %v282_v40, %v232_v23  ;;  %v291_v47 = vrot.slane %v236_v38, 4  ;;  %v122_v37 = vrot.slane %v121_v35, 4  ;;  %vm173_vm6 = vcmp.eq.s32.totalorder %v738_v10, 1 }
  0x18   :  { %v287_v41 = vsel %vm286_vm3, %v285_v42, %v284_v36  ;;  %v104_v48 = vadd.f32 %v103_v29, %v102_v31  ;;  %v111_v49 = vadd.f32 %v110_v45, %v109_v32  ;;  %v118_v44 = vadd.f32 %v117_v46, %v116_v34 }
  0x19   :  { %v290_v50 = vsel %vm289_vm4, %v288_v43, %v287_v41  ;;  %v123_v51 = vadd.f32 %v122_v37, %v121_v35  ;;  %vm175_vm7 = vcmp.eq.s32.totalorder %v738_v10, 3  ;;  %v178_v52 = vsel %vm173_vm6, 0.1, %v681_v28 }
  0x1a   :  { %v293_v53 = vsel %vm292_vm5, %v291_v47, %v290_v50  ;;  %v105_v54 = vrot.slane %v104_v48, 1  ;;  %v112_v55 = vrot.slane %v111_v49, 1  ;;  %v119_v56 = vrot.slane %v118_v44, 1 }
  0x1b   :  { %331 = vst [vmem:[%s1033_s2] sm:$0x1f] %v293_v53  ;;  %v124_v57 = vrot.slane %v123_v51, 2  ;;  %v816_v58 = vsel %vm175_vm7, 0.1, %v681_v28  ;;  %v191_v59 = vrot.slane %v178_v52, 1  ;;  %v192_v60 = vrot.slane %v178_v52, 2 }
  0x1c   :  { %v106_v61 = vadd.f32 %v105_v54, %v104_v48  ;;  %v113_v62 = vadd.f32 %v112_v55, %v111_v49  ;;  %v120_v63 = vadd.f32 %v119_v56, %v118_v44  ;;  %v193_v0 = vrot.slane %v178_v52, 3 }
  0x1d   :  { %v125_v7 = vadd.f32 %v124_v57, %v123_v51  ;;  %v194_v8 = vrot.slane %v178_v52, 4  ;;  %v199_v9 = vrot.slane %v816_v58, 1  ;;  %v203_v14 = vrot.slane %v780_v33, 1 }
  0x1e   :  { %v237_v15 = vadd.f32 %v178_v52, %v78_v16  ;;  %v238_v20 = vadd.f32 %v191_v59, %v106_v61  ;;  %v239_v21 = vadd.f32 %v192_v60, %v113_v62  ;;  %v240_v23 = vadd.f32 %v193_v0, %v120_v63 }
  0x1f   :  { %v126_v24 = vrot.slane %v125_v7, 1  ;;  %v820_v25 = vadd.f32 %v199_v9, %v120_v63  ;;  %v53_v26 = vmul.f32 %v725_v5, %v725_v5  ;;  %v54_v27 = vmul.f32 %v730_v6, %v730_v6 }
  0x20   :  { %v294_v30 = vrot.slane %v238_v20, 7  ;;  %v296_v31 = vrot.slane %v239_v21, 6  ;;  %v298_v17 = vrot.slane %v240_v23, 5  ;;  %v55_v32 = vmul.f32 %v743_v11, %v725_v5 }
  0x21   :  { %v127_v34 = vadd.f32 %v126_v24, %v125_v7  ;;  %v56_v16 = vmul.f32 %v748_v12, %v730_v6  ;;  %v57_v35 = vmul.f32 %v753_v13, %v725_v5  ;;  %v58_v38 = vmul.f32 %v766_v18, %v730_v6 }
  0x22   :  { %v295_v40 = vsel %vm283_vm2, %v294_v30, %v237_v15  ;;  %v128_v42 = vadd.f32 %v54_v27, %v53_v26  ;;  %vm174_vm8 = vcmp.eq.s32.totalorder %v738_v10, 2  ;;  %v204_v43 = vrot.slane %v780_v33, 2 }
  0x23   :  { %v241_v29 = vadd.f32 %v194_v8, %v127_v34  ;;  %v837_v45 = vadd.f32 %v203_v14, %v127_v34  ;;  %v297_v46 = vsel %vm286_vm3, %v296_v31, %v295_v40  ;;  %v135_v36 = vadd.f32 %v56_v16, %v55_v32 }
  0x24   :  { %v299_v47 = vsel %vm289_vm4, %v298_v17, %v297_v46  ;;  %v129_v37 = vrot.slane %v128_v42, 4  ;;  %v142_v41 = vadd.f32 %v58_v38, %v57_v35  ;;  %v179_v48 = vsel %vm174_vm8, 0.1, %v681_v28 }
  0x25   :  { %v300_v49 = vrot.slane %v241_v29, 4  ;;  %v318_v44 = vrot.slane %v837_v45, 7  ;;  %v136_v50 = vrot.slane %v135_v36, 4  ;;  %v195_v51 = vrot.slane %v179_v48, 1 }
  0x26   :  { %v130_v10 = vadd.f32 %v129_v37, %v128_v42  ;;  %v143_v52 = vrot.slane %v142_v41, 4  ;;  %v196_v53 = vrot.slane %v179_v48, 2  ;;  %v197_v54 = vrot.slane %v179_v48, 3 }
  0x27   :  { %v301_v55 = vsel %vm292_vm5, %v300_v49, %v299_v47  ;;  %v137_v56 = vadd.f32 %v136_v50, %v135_v36  ;;  %v198_v57 = vrot.slane %v179_v48, 4  ;;  %v242_v59 = vadd.f32 %v179_v48, %v796_v19 }
  0x28   :  { %332 = vst [vmem:[%s1033_s2 + $0x8] sm:$0x1f] %v301_v55  ;;  %v131_v28 = vrot.slane %v130_v10, 2  ;;  %v144_v60 = vadd.f32 %v143_v52, %v142_v41  ;;  %v243_v61 = vadd.f32 %v195_v51, %v113_v62  ;;  %v59_v63 = vmul.f32 %v743_v11, %v743_v11 }
  0x29   :  { %v138_v0 = vrot.slane %v137_v56, 2  ;;  %v60_v7 = vmul.f32 %v748_v12, %v748_v12  ;;  %v61_v8 = vmul.f32 %v753_v13, %v743_v11  ;;  %v62_v19 = vmul.f32 %v766_v18, %v748_v12 }
  0x2a   :  { %v132_v9 = vadd.f32 %v131_v28, %v130_v10  ;;  %v145_v14 = vrot.slane %v144_v60, 2  ;;  %v302_v15 = vrot.slane %v243_v61, 7  ;;  %v200_v20 = vrot.slane %v816_v58, 2 }
  0x2b   :  { %v139_v21 = vadd.f32 %v138_v0, %v137_v56  ;;  %v149_v62 = vadd.f32 %v60_v7, %v59_v63  ;;  %v156_v23 = vadd.f32 %v62_v19, %v61_v8  ;;  %v201_v24 = vrot.slane %v816_v58, 3 }
  0x2c   :  { %v133_v26 = vrot.slane %v132_v9, 1  ;;  %v146_v27 = vadd.f32 %v145_v14, %v144_v60  ;;  %v303_v30 = vsel %vm283_vm2, %v302_v15, %v242_v59  ;;  %v202_v31 = vrot.slane %v816_v58, 4 }
  0x2d   :  { %v140_v17 = vrot.slane %v139_v21, 1  ;;  %v150_v32 = vrot.slane %v149_v62, 4  ;;  %v157_v34 = vrot.slane %v156_v23, 4  ;;  %v247_v16 = vadd.f32 %v816_v58, %v798_v22 }
  0x2e   :  { %v134_v35 = vadd.f32 %v133_v26, %v132_v9  ;;  %v147_v38 = vrot.slane %v146_v27, 1  ;;  %v310_v40 = vrot.slane %v820_v25, 7  ;;  %v63_v42 = vmul.f32 %v753_v13, %v753_v13 }
  0x2f   :  { %v141_v29 = vadd.f32 %v140_v17, %v139_v21  ;;  %v151_v46 = vadd.f32 %v150_v32, %v149_v62  ;;  %v158_v36 = vadd.f32 %v157_v34, %v156_v23  ;;  %v64_v47 = vmul.f32 %v766_v18, %v766_v18 }
  0x30   :  { %v148_v37 = vadd.f32 %v147_v38, %v146_v27  ;;  %v244_v41 = vadd.f32 %v196_v53, %v134_v35  ;;  %v311_v48 = vsel %vm283_vm2, %v310_v40, %v247_v16  ;;  %v205_v49 = vrot.slane %v780_v33, 3 }
  0x31   :  { %v245_v22 = vadd.f32 %v197_v54, %v141_v29  ;;  %v152_v58 = vrot.slane %v151_v46, 2  ;;  %v159_v50 = vrot.slane %v158_v36, 2  ;;  %v249_v51 = vadd.f32 %v200_v20, %v141_v29  ;;  %v23_v54 = vld [vmem:[%s1034_s1] sm:$0xff] }
  0x32   :  { %v246_v25 = vadd.f32 %v198_v57, %v148_v37  ;;  %v254_v10 = vadd.f32 %v204_v43, %v148_v37  ;;  %v304_v52 = vrot.slane %v244_v41, 6  ;;  %v163_v55 = vadd.f32 %v64_v47, %v63_v42  ;;  %v24_v43 = vld [vmem:[%s1034_s1 + $0x8] sm:$0xff]  ;;  %v25_v37 = vld [vmem:[%s1034_s1 + $0x10] sm:$0xff] }
  0x33   :  { %v306_v56 = vrot.slane %v245_v22, 5  ;;  %v153_v59 = vadd.f32 %v152_v58, %v151_v46  ;;  %v160_v28 = vadd.f32 %v159_v50, %v158_v36  ;;  %v312_v60 = vrot.slane %v249_v51, 6  ;;  %v26_v58 = vld [vmem:[%s1034_s1 + $0x18] sm:$0xff] }
  0x34   :  { %v305_v53 = vsel %vm286_vm3, %v304_v52, %v303_v30  ;;  %v308_v61 = vrot.slane %v246_v25, 4  ;;  %v164_v63 = vrot.slane %v163_v55, 4  ;;  %v206_v0 = vrot.slane %v780_v33, 4 }
  0x35   :  { %v307_v57 = vsel %vm289_vm4, %v306_v56, %v305_v53  ;;  %v154_v7 = vrot.slane %v153_v59, 1  ;;  %v161_v8 = vrot.slane %v160_v28, 1  ;;  %v313_v19 = vsel %vm286_vm3, %v312_v60, %v311_v48 }
  0x36   :  { %v309_v9 = vsel %vm292_vm5, %v308_v61, %v307_v57  ;;  %v165_v14 = vadd.f32 %v164_v63, %v163_v55  ;;  %v319_v33 = vsel %vm283_vm2, %v318_v44, %v803_v39  ;;  %v320_v15 = vrot.slane %v254_v10, 6 }
  0x37   :  { %333 = vst [vmem:[%s1033_s2 + $0x10] sm:$0x1f] %v309_v9  ;;  %v155_v20 = vadd.f32 %v154_v7, %v153_v59  ;;  %v162_v21 = vadd.f32 %v161_v8, %v160_v28  ;;  %v336_v62 = vmul.f32 %v23_v54, %v705_v1  ;;  %v337_v23 = vmul.f32 %v24_v43, %v710_v2 }
  0x38   :  { %v166_v26 = vrot.slane %v165_v14, 2  ;;  %v321_v27 = vsel %vm286_vm3, %v320_v15, %v319_v33  ;;  %v338_v30 = vmul.f32 %v23_v54, %v715_v3  ;;  %v339_v45 = vmul.f32 %v24_v43, %v720_v4 }
  0x39   :  { %v250_v17 = vadd.f32 %v201_v24, %v155_v20  ;;  %v251_v39 = vadd.f32 %v202_v31, %v162_v21  ;;  %v255_v44 = vadd.f32 %v205_v49, %v162_v21  ;;  %v340_v32 = vmul.f32 %v23_v54, %v725_v5 }
  0x3a   :  { %v167_v34 = vadd.f32 %v166_v26, %v165_v14  ;;  %v341_v16 = vmul.f32 %v24_v43, %v730_v6  ;;  %v342_v35 = vmul.f32 %v23_v54, %v743_v11  ;;  %v343_v38 = vmul.f32 %v24_v43, %v748_v12 }
  0x3b   :  { %v314_v40 = vrot.slane %v250_v17, 5  ;;  %v316_v42 = vrot.slane %v251_v39, 4  ;;  %v322_v29 = vrot.slane %v255_v44, 5  ;;  %v344_v46 = vmul.f32 %v23_v54, %v753_v13 }
  0x3c   :  { %v168_v36 = vrot.slane %v167_v34, 1  ;;  %v345_v47 = vmul.f32 %v24_v43, %v766_v18  ;;  %v396_v24 = vadd.f32 %v337_v23, %v336_v62  ;;  %v403_v31 = vadd.f32 %v339_v45, %v338_v30 }
  0x3d   :  { %v315_v41 = vsel %vm289_vm4, %v314_v40, %v313_v19  ;;  %v323_v48 = vsel %vm289_vm4, %v322_v29, %v321_v27  ;;  %v410_v49 = vadd.f32 %v341_v16, %v340_v32  ;;  %v417_v22 = vadd.f32 %v343_v38, %v342_v35 }
  0x3e   :  { %v317_v50 = vsel %vm292_vm5, %v316_v42, %v315_v41  ;;  %v169_v51 = vadd.f32 %v168_v36, %v167_v34  ;;  %v397_v25 = vrot.slane %v396_v24, 4  ;;  %v404_v10 = vrot.slane %v403_v31, 4 }
  0x3f   :  { %334 = vst [vmem:[%s1033_s2 + $0x18] sm:$0x1f] %v317_v50  ;;  %v411_v52 = vrot.slane %v410_v49, 4  ;;  %v418_v55 = vrot.slane %v417_v22, 4  ;;  %v424_v56 = vadd.f32 %v345_v47, %v344_v46  ;;  %v346_v59 = vmul.f32 %v25_v37, %v705_v1 }
  0x40   :  { %v256_v28 = vadd.f32 %v206_v0, %v169_v51  ;;  %v398_v60 = vadd.f32 %v397_v25, %v396_v24  ;;  %v405_v53 = vadd.f32 %v404_v10, %v403_v31  ;;  %v347_v61 = vmul.f32 %v26_v58, %v710_v2  ;;  %v28_v10 = vld [vmem:[%s1034_s1 + $0x28] sm:$0xff] }
  0x41   :  { %v412_v63 = vadd.f32 %v411_v52, %v410_v49  ;;  %v419_v54 = vadd.f32 %v418_v55, %v417_v22  ;;  %v425_v43 = vrot.slane %v424_v56, 4  ;;  %v348_v57 = vmul.f32 %v25_v37, %v715_v3 }
  0x42   :  { %v324_v7 = vrot.slane %v256_v28, 4  ;;  %v399_v8 = vrot.slane %v398_v60, 2  ;;  %v406_v19 = vrot.slane %v405_v53, 2  ;;  %v349_v9 = vmul.f32 %v26_v58, %v720_v4 }
  0x43   :  { %v413_v14 = vrot.slane %v412_v63, 2  ;;  %v420_v33 = vrot.slane %v419_v54, 2  ;;  %v426_v15 = vadd.f32 %v425_v43, %v424_v56  ;;  %v350_v20 = vmul.f32 %v25_v37, %v725_v5 }
  0x44   :  { %v325_v0 = vsel %vm292_vm5, %v324_v7, %v323_v48  ;;  %v400_v21 = vadd.f32 %v399_v8, %v398_v60  ;;  %v407_v62 = vadd.f32 %v406_v19, %v405_v53  ;;  %v351_v23 = vmul.f32 %v26_v58, %v730_v6 }
  0x45   :  { %335 = vst [vmem:[%s1033_s2 + $0x20] sm:$0x1f] %v325_v0  ;;  %v414_v26 = vadd.f32 %v413_v14, %v412_v63  ;;  %v421_v27 = vadd.f32 %v420_v33, %v419_v54  ;;  %v427_v30 = vrot.slane %v426_v15, 2  ;;  %v352_v45 = vmul.f32 %v25_v37, %v743_v11 }
  0x46   :  { %v401_v17 = vrot.slane %v400_v21, 1  ;;  %v408_v39 = vrot.slane %v407_v62, 1  ;;  %v353_v44 = vmul.f32 %v26_v58, %v748_v12  ;;  %v354_v32 = vmul.f32 %v25_v37, %v753_v13  ;;  %v27_v37 = vld [vmem:[%s1034_s1 + $0x20] sm:$0xff] }
  0x47   :  { %v415_v34 = vrot.slane %v414_v26, 1  ;;  %v422_v16 = vrot.slane %v421_v27, 1  ;;  %v428_v35 = vadd.f32 %v427_v30, %v426_v15  ;;  %v355_v38 = vmul.f32 %v26_v58, %v766_v18 }
  0x48   :  { %v402_v40 = vadd.f32 %v401_v17, %v400_v21  ;;  %v409_v42 = vadd.f32 %v408_v39, %v407_v62  ;;  %v431_v29 = vadd.f32 %v347_v61, %v346_v59  ;;  %v438_v46 = vadd.f32 %v349_v9, %v348_v57 }
  0x49   :  { %v416_v36 = vadd.f32 %v415_v34, %v414_v26  ;;  %v423_v47 = vadd.f32 %v422_v16, %v421_v27  ;;  %v429_v24 = vrot.slane %v428_v35, 1  ;;  %v445_v31 = vadd.f32 %v351_v23, %v350_v20 }
  0x4a   :  { %v636_v41 = vsel %vm283_vm2, %v409_v42, %v402_v40  ;;  %v432_v48 = vrot.slane %v431_v29, 4  ;;  %v439_v49 = vrot.slane %v438_v46, 4  ;;  %v452_v22 = vadd.f32 %v353_v44, %v352_v45 }
  0x4b   :  { %v430_v50 = vadd.f32 %v429_v24, %v428_v35  ;;  %v637_v58 = vsel %vm286_vm3, %v416_v36, %v636_v41  ;;  %v446_v51 = vrot.slane %v445_v31, 4  ;;  %v459_v25 = vadd.f32 %v355_v38, %v354_v32  ;;  %v29_v41 = vld [vmem:[%s1034_s1 + $0x30] sm:$0xff] }
  0x4c   :  { %v638_v52 = vsel %vm289_vm4, %v423_v47, %v637_v58  ;;  %v433_v55 = vadd.f32 %v432_v48, %v431_v29  ;;  %v440_v56 = vadd.f32 %v439_v49, %v438_v46  ;;  %v453_v59 = vrot.slane %v452_v22, 4 }
  0x4d   :  { %v639_v28 = vsel %vm292_vm5, %v430_v50, %v638_v52  ;;  %v447_v60 = vadd.f32 %v446_v51, %v445_v31  ;;  %v460_v53 = vrot.slane %v459_v25, 4  ;;  %v356_v61 = vmul.f32 %v27_v37, %v705_v1  ;;  %v30_v50 = vld [vmem:[%s1034_s1 + $0x38] sm:$0xff] }
  0x4e   :  { %666 = vst [vmem:[%s1035_s3] sm:$0x1f] %v639_v28  ;;  %v434_v63 = vrot.slane %v433_v55, 2  ;;  %v441_v54 = vrot.slane %v440_v56, 2  ;;  %v454_v43 = vadd.f32 %v453_v59, %v452_v22  ;;  %v357_v57 = vmul.f32 %v28_v10, %v710_v2 }
  0x4f   :  { %v448_v7 = vrot.slane %v447_v60, 2  ;;  %v461_v8 = vadd.f32 %v460_v53, %v459_v25  ;;  %v358_v19 = vmul.f32 %v27_v37, %v715_v3  ;;  %v359_v9 = vmul.f32 %v28_v10, %v720_v4 }
  0x50   :  { %v435_v14 = vadd.f32 %v434_v63, %v433_v55  ;;  %v442_v33 = vadd.f32 %v441_v54, %v440_v56  ;;  %v455_v15 = vrot.slane %v454_v43, 2  ;;  %v360_v20 = vmul.f32 %v27_v37, %v725_v5 }
  0x51   :  { %v449_v0 = vadd.f32 %v448_v7, %v447_v60  ;;  %v462_v21 = vrot.slane %v461_v8, 2  ;;  %v361_v62 = vmul.f32 %v28_v10, %v730_v6  ;;  %v362_v23 = vmul.f32 %v27_v37, %v743_v11 }
  0x52   :  { %v436_v26 = vrot.slane %v435_v14, 1  ;;  %v443_v27 = vrot.slane %v442_v33, 1  ;;  %v456_v30 = vadd.f32 %v455_v15, %v454_v43  ;;  %v363_v45 = vmul.f32 %v28_v10, %v748_v12 }
  0x53   :  { %v450_v17 = vrot.slane %v449_v0, 1  ;;  %v463_v39 = vadd.f32 %v462_v21, %v461_v8  ;;  %v364_v44 = vmul.f32 %v27_v37, %v753_v13  ;;  %v365_v32 = vmul.f32 %v28_v10, %v766_v18 }
  0x54   :  { %v437_v34 = vadd.f32 %v436_v26, %v435_v14  ;;  %v444_v16 = vadd.f32 %v443_v27, %v442_v33  ;;  %v457_v35 = vrot.slane %v456_v30, 1  ;;  %v466_v38 = vadd.f32 %v357_v57, %v356_v61 }
  0x55   :  { %v451_v40 = vadd.f32 %v450_v17, %v449_v0  ;;  %v464_v42 = vrot.slane %v463_v39, 1  ;;  %v473_v29 = vadd.f32 %v359_v9, %v358_v19  ;;  %v480_v46 = vadd.f32 %v361_v62, %v360_v20 }
  0x56   :  { %v458_v36 = vadd.f32 %v457_v35, %v456_v30  ;;  %v640_v47 = vsel %vm283_vm2, %v444_v16, %v437_v34  ;;  %v467_v24 = vrot.slane %v466_v38, 4  ;;  %v487_v31 = vadd.f32 %v363_v45, %v362_v23 }
  0x57   :  { %v465_v48 = vadd.f32 %v464_v42, %v463_v39  ;;  %v641_v49 = vsel %vm286_vm3, %v451_v40, %v640_v47  ;;  %v474_v22 = vrot.slane %v473_v29, 4  ;;  %v481_v37 = vrot.slane %v480_v46, 4 }
  0x58   :  { %v642_v58 = vsel %vm289_vm4, %v458_v36, %v641_v49  ;;  %v468_v51 = vadd.f32 %v467_v24, %v466_v38  ;;  %v488_v25 = vrot.slane %v487_v31, 4  ;;  %v494_v10 = vadd.f32 %v365_v32, %v364_v44 }
  0x59   :  { %v643_v52 = vsel %vm292_vm5, %v465_v48, %v642_v58  ;;  %v475_v55 = vadd.f32 %v474_v22, %v473_v29  ;;  %v482_v56 = vadd.f32 %v481_v37, %v480_v46  ;;  %v366_v59 = vmul.f32 %v29_v41, %v705_v1 }
  0x5a   :  { %667 = vst [vmem:[%s1035_s3 + $0x8] sm:$0x1f] %v643_v52  ;;  %v469_v28 = vrot.slane %v468_v51, 2  ;;  %v489_v60 = vadd.f32 %v488_v25, %v487_v31  ;;  %v495_v53 = vrot.slane %v494_v10, 4  ;;  %v367_v61 = vmul.f32 %v30_v50, %v710_v2 }
  0x5b   :  { %v476_v63 = vrot.slane %v475_v55, 2  ;;  %v483_v54 = vrot.slane %v482_v56, 2  ;;  %v368_v43 = vmul.f32 %v29_v41, %v715_v3  ;;  %v369_v57 = vmul.f32 %v30_v50, %v720_v4 }
  0x5c   :  { %v470_v7 = vadd.f32 %v469_v28, %v468_v51  ;;  %v490_v8 = vrot.slane %v489_v60, 2  ;;  %v496_v19 = vadd.f32 %v495_v53, %v494_v10  ;;  %v370_v9 = vmul.f32 %v29_v41, %v725_v5 }
  0x5d   :  { %v477_v14 = vadd.f32 %v476_v63, %v475_v55  ;;  %v484_v33 = vadd.f32 %v483_v54, %v482_v56  ;;  %v371_v15 = vmul.f32 %v30_v50, %v730_v6  ;;  %v372_v20 = vmul.f32 %v29_v41, %v743_v11 }
  0x5e   :  { %v471_v0 = vrot.slane %v470_v7, 1  ;;  %v491_v21 = vadd.f32 %v490_v8, %v489_v60  ;;  %v497_v62 = vrot.slane %v496_v19, 2  ;;  %v373_v23 = vmul.f32 %v30_v50, %v748_v12 }
  0x5f   :  { %v478_v26 = vrot.slane %v477_v14, 1  ;;  %v485_v27 = vrot.slane %v484_v33, 1  ;;  %v374_v30 = vmul.f32 %v29_v41, %v753_v13  ;;  %v375_v45 = vmul.f32 %v30_v50, %v766_v18  ;;  %v31_v41 = vld [vmem:[%s1034_s1 + $0x40] sm:$0xff]  ;;  %v32_v50 = vld [vmem:[%s1034_s1 + $0x48] sm:$0xff] }
  0x60   :  { %v472_v17 = vadd.f32 %v471_v0, %v470_v7  ;;  %v492_v39 = vrot.slane %v491_v21, 1  ;;  %v498_v44 = vadd.f32 %v497_v62, %v496_v19  ;;  %v501_v32 = vadd.f32 %v367_v61, %v366_v59 }
  0x61   :  { %v479_v34 = vadd.f32 %v478_v26, %v477_v14  ;;  %v486_v16 = vadd.f32 %v485_v27, %v484_v33  ;;  %v508_v35 = vadd.f32 %v369_v57, %v368_v43  ;;  %v515_v38 = vadd.f32 %v371_v15, %v370_v9 }
  0x62   :  { %v493_v40 = vadd.f32 %v492_v39, %v491_v21  ;;  %v499_v42 = vrot.slane %v498_v44, 1  ;;  %v502_v29 = vrot.slane %v501_v32, 4  ;;  %v522_v46 = vadd.f32 %v373_v23, %v372_v20 }
  0x63   :  { %v644_v36 = vsel %vm283_vm2, %v479_v34, %v472_v17  ;;  %v509_v47 = vrot.slane %v508_v35, 4  ;;  %v516_v24 = vrot.slane %v515_v38, 4  ;;  %v529_v31 = vadd.f32 %v375_v45, %v374_v30 }
  0x64   :  { %v500_v48 = vadd.f32 %v499_v42, %v498_v44  ;;  %v645_v49 = vsel %vm286_vm3, %v486_v16, %v644_v36  ;;  %v503_v22 = vadd.f32 %v502_v29, %v501_v32  ;;  %v523_v37 = vrot.slane %v522_v46, 4 }
  0x65   :  { %v646_v58 = vsel %vm289_vm4, %v493_v40, %v645_v49  ;;  %v510_v51 = vadd.f32 %v509_v47, %v508_v35  ;;  %v517_v25 = vadd.f32 %v516_v24, %v515_v38  ;;  %v530_v10 = vrot.slane %v529_v31, 4  ;;  %v33_v40 = vld [vmem:[%s1034_s1 + $0x50] sm:$0xff] }
  0x66   :  { %v647_v52 = vsel %vm292_vm5, %v500_v48, %v646_v58  ;;  %v504_v55 = vrot.slane %v503_v22, 2  ;;  %v524_v56 = vadd.f32 %v523_v37, %v522_v46  ;;  %v376_v59 = vmul.f32 %v31_v41, %v705_v1  ;;  %v34_v48 = vld [vmem:[%s1034_s1 + $0x58] sm:$0xff] }
  0x67   :  { %668 = vst [vmem:[%s1035_s3 + $0x10] sm:$0x1f] %v647_v52  ;;  %v511_v28 = vrot.slane %v510_v51, 2  ;;  %v518_v60 = vrot.slane %v517_v25, 2  ;;  %v531_v53 = vadd.f32 %v530_v10, %v529_v31  ;;  %v377_v61 = vmul.f32 %v32_v50, %v710_v2 }
  0x68   :  { %v505_v63 = vadd.f32 %v504_v55, %v503_v22  ;;  %v525_v54 = vrot.slane %v524_v56, 2  ;;  %v378_v43 = vmul.f32 %v31_v41, %v715_v3  ;;  %v379_v57 = vmul.f32 %v32_v50, %v720_v4 }
  0x69   :  { %v512_v7 = vadd.f32 %v511_v28, %v510_v51  ;;  %v519_v8 = vadd.f32 %v518_v60, %v517_v25  ;;  %v532_v19 = vrot.slane %v531_v53, 2  ;;  %v380_v9 = vmul.f32 %v31_v41, %v725_v5 }
  0x6a   :  { %v506_v14 = vrot.slane %v505_v63, 1  ;;  %v526_v33 = vadd.f32 %v525_v54, %v524_v56  ;;  %v381_v15 = vmul.f32 %v32_v50, %v730_v6  ;;  %v382_v20 = vmul.f32 %v31_v41, %v743_v11 }
  0x6b   :  { %v513_v0 = vrot.slane %v512_v7, 1  ;;  %v520_v21 = vrot.slane %v519_v8, 1  ;;  %v533_v62 = vadd.f32 %v532_v19, %v531_v53  ;;  %v383_v23 = vmul.f32 %v32_v50, %v748_v12 }
  0x6c   :  { %v507_v26 = vadd.f32 %v506_v14, %v505_v63  ;;  %v527_v27 = vrot.slane %v526_v33, 1  ;;  %v384_v30 = vmul.f32 %v31_v41, %v753_v13  ;;  %v385_v45 = vmul.f32 %v32_v50, %v766_v18 }
  0x6d   :  { %v514_v17 = vadd.f32 %v513_v0, %v512_v7  ;;  %v521_v39 = vadd.f32 %v520_v21, %v519_v8  ;;  %v534_v44 = vrot.slane %v533_v62, 1  ;;  %v536_v32 = vadd.f32 %v377_v61, %v376_v59 }
  0x6e   :  { %v528_v34 = vadd.f32 %v527_v27, %v526_v33  ;;  %v543_v16 = vadd.f32 %v379_v57, %v378_v43  ;;  %v550_v35 = vadd.f32 %v381_v15, %v380_v9  ;;  %v557_v38 = vadd.f32 %v383_v23, %v382_v20 }
  0x6f   :  { %v535_v42 = vadd.f32 %v534_v44, %v533_v62  ;;  %v648_v29 = vsel %vm283_vm2, %v514_v17, %v507_v26  ;;  %v537_v46 = vrot.slane %v536_v32, 4  ;;  %v564_v36 = vadd.f32 %v385_v45, %v384_v30 }
  0x70   :  { %v649_v47 = vsel %vm286_vm3, %v521_v39, %v648_v29  ;;  %v544_v24 = vrot.slane %v543_v16, 4  ;;  %v551_v31 = vrot.slane %v550_v35, 4  ;;  %v558_v41 = vrot.slane %v557_v38, 4 }
  0x71   :  { %v650_v49 = vsel %vm289_vm4, %v528_v34, %v649_v47  ;;  %v538_v22 = vadd.f32 %v537_v46, %v536_v32  ;;  %v565_v37 = vrot.slane %v564_v36, 4  ;;  %v386_v50 = vmul.f32 %v33_v40, %v705_v1 }
  0x72   :  { %v651_v58 = vsel %vm292_vm5, %v535_v42, %v650_v49  ;;  %v545_v51 = vadd.f32 %v544_v24, %v543_v16  ;;  %v552_v25 = vadd.f32 %v551_v31, %v550_v35  ;;  %v559_v10 = vadd.f32 %v558_v41, %v557_v38 }
  0x73   :  { %669 = vst [vmem:[%s1035_s3 + $0x18] sm:$0x1f] %v651_v58  ;;  %v539_v52 = vrot.slane %v538_v22, 2  ;;  %v566_v55 = vadd.f32 %v565_v37, %v564_v36  ;;  %v387_v56 = vmul.f32 %v34_v48, %v710_v2  ;;  %v388_v59 = vmul.f32 %v33_v40, %v715_v3 }
  0x74   :  { %v546_v28 = vrot.slane %v545_v51, 2  ;;  %v553_v60 = vrot.slane %v552_v25, 2  ;;  %v560_v53 = vrot.slane %v559_v10, 2  ;;  %v389_v1 = vmul.f32 %v34_v48, %v720_v4 }
  0x75   :  { %v540_v61 = vadd.f32 %v539_v52, %v538_v22  ;;  %v567_v63 = vrot.slane %v566_v55, 2  ;;  %v390_v54 = vmul.f32 %v33_v40, %v725_v5  ;;  %v391_v43 = vmul.f32 %v34_v48, %v730_v6 }
  0x76   :  { %v547_v57 = vadd.f32 %v546_v28, %v545_v51  ;;  %v554_v7 = vadd.f32 %v553_v60, %v552_v25  ;;  %v561_v8 = vadd.f32 %v560_v53, %v559_v10  ;;  %v392_v19 = vmul.f32 %v33_v40, %v743_v11 }
  0x77   :  { %v541_v9 = vrot.slane %v540_v61, 1  ;;  %v568_v2 = vadd.f32 %v567_v63, %v566_v55  ;;  %v393_v3 = vmul.f32 %v34_v48, %v748_v12  ;;  %v394_v14 = vmul.f32 %v33_v40, %v753_v13 }
  0x78   :  { %v548_v33 = vrot.slane %v547_v57, 1  ;;  %v555_v15 = vrot.slane %v554_v7, 1  ;;  %v562_v4 = vrot.slane %v561_v8, 1  ;;  %v395_v20 = vmul.f32 %v34_v48, %v766_v18 }
  0x79   :  { %v542_v0 = vadd.f32 %v541_v9, %v540_v61  ;;  %v569_v5 = vrot.slane %v568_v2, 1  ;;  %v571_v21 = vadd.f32 %v387_v56, %v386_v50  ;;  %v578_v6 = vadd.f32 %v389_v1, %v388_v59 }
  0x7a   :  { %v549_v62 = vadd.f32 %v548_v33, %v547_v57  ;;  %v556_v23 = vadd.f32 %v555_v15, %v554_v7  ;;  %v563_v26 = vadd.f32 %v562_v4, %v561_v8  ;;  %v585_v27 = vadd.f32 %v391_v43, %v390_v54 }
  0x7b   :  { %v570_v11 = vadd.f32 %v569_v5, %v568_v2  ;;  %v572_v30 = vrot.slane %v571_v21, 4  ;;  %v579_v45 = vrot.slane %v578_v6, 4  ;;  %v592_v17 = vadd.f32 %v393_v3, %v392_v19 }
  0x7c   :  { %v652_v12 = vsel %vm283_vm2, %v549_v62, %v542_v0  ;;  %v586_v13 = vrot.slane %v585_v27, 4  ;;  %v599_v39 = vadd.f32 %v395_v20, %v394_v14 }
  0x7d   :  { %v653_v44 = vsel %vm286_vm3, %v556_v23, %v652_v12  ;;  %v573_v32 = vadd.f32 %v572_v30, %v571_v21  ;;  %v580_v18 = vadd.f32 %v579_v45, %v578_v6  ;;  %v593_v34 = vrot.slane %v592_v17, 4 }
  0x7e   :  { %v654_v16 = vsel %vm289_vm4, %v563_v26, %v653_v44  ;;  %v587_v35 = vadd.f32 %v586_v13, %v585_v27  ;;  %v600_v38 = vrot.slane %v599_v39, 4 }
  0x7f   :  { %v655_v40 = vsel %vm292_vm5, %v570_v11, %v654_v16  ;;  %v574_v42 = vrot.slane %v573_v32, 2  ;;  %v581_v29 = vrot.slane %v580_v18, 2  ;;  %v594_v46 = vadd.f32 %v593_v34, %v592_v17 }
  0x80   :  { %670 = vst [vmem:[%s1035_s3 + $0x20] sm:$0x1f] %v655_v40  ;;  %v588_v36 = vrot.slane %v587_v35, 2  ;;  %v601_v47 = vadd.f32 %v600_v38, %v599_v39 }
  0x81   :  { %v575_v24 = vadd.f32 %v574_v42, %v573_v32  ;;  %v582_v31 = vadd.f32 %v581_v29, %v580_v18  ;;  %v595_v41 = vrot.slane %v594_v46, 2 }
  0x82   :  { %v589_v48 = vadd.f32 %v588_v36, %v587_v35  ;;  %v602_v49 = vrot.slane %v601_v47, 2 }
  0x83   :  { %v576_v22 = vrot.slane %v575_v24, 1  ;;  %v583_v37 = vrot.slane %v582_v31, 1  ;;  %v596_v50 = vadd.f32 %v595_v41, %v594_v46 }
  0x84   :  { %v590_v58 = vrot.slane %v589_v48, 1  ;;  %v603_v51 = vadd.f32 %v602_v49, %v601_v47 }
  0x85   :  { %v577_v25 = vadd.f32 %v576_v22, %v575_v24  ;;  %v584_v10 = vadd.f32 %v583_v37, %v582_v31  ;;  %v597_v52 = vrot.slane %v596_v50, 1 }
  0x86   :  { %v591_v55 = vadd.f32 %v590_v58, %v589_v48  ;;  %v604_v56 = vrot.slane %v603_v51, 1 }
  0x87   :  { %v598_v59 = vadd.f32 %v597_v52, %v596_v50  ;;  %v656_v28 = vsel %vm283_vm2, %v584_v10, %v577_v25 }
  0x88   :  { %v605_v60 = vadd.f32 %v604_v56, %v603_v51  ;;  %v657_v53 = vsel %vm286_vm3, %v591_v55, %v656_v28 }
  0x89   :  { %v658_v1 = vsel %vm289_vm4, %v598_v59, %v657_v53 }
  0x8a   :  { %v659_v61 = vsel %vm292_vm5, %v605_v60, %v658_v1 }
  0x8b   :  { %671 = vst [vmem:[%s1035_s3 + $0x28] sm:$0x1f] %v659_v61 }

// kernel: ls_svm_head.3
= control target key start
LH: loop header
LB: loop body
LE: loop exit
PB: predicated region body
PF: predicated region fallthrough
CT: control target
= control target key end

     0   :  { %vm55_vm0 = vcmask 1044480   ;;  %vm338_vm1 = vcmask 1041409   ;;  %vm341_vm2 = vcmask 1042434   ;;  %vm344_vm3 = vcmask 1043459   ;;  %s617_s0 = inlined_call_operand.vmem [shape: f32[6,5,128], index: 0, kind: input, shape index: {}]   ;;  %s618_s1 = inlined_call_operand.vmem [shape: f32[5,5,128], index: 1, kind: input, shape index: {}]   ;;  %s619_s2 = inlined_call_operand.vmem [shape: f32[1,5,128], index: 2, kind: input, shape index: {}]   ;;  %s620_s3 = inlined_call_operand.vmem [shape: f32[6,5,128], index: 3, kind: output, shape index: {}]  }
   0x1   :  { %v14_v0 = vld [vmem:[%s617_s0] sm:$0x1f]  ;;  %v436_v2 = vld [vmem:[%s618_s1 + $0x8] sm:$0x1f]  ;;  %v441_v3 = vld [vmem:[%s618_s1 + $0x10] sm:$0x1f] }
   0x2   :  { %v431_v1 = vld [vmem:[%s618_s1] sm:$0x1f]  ;;  %v446_v4 = vld [vmem:[%s618_s1 + $0x18] sm:$0x1f]  ;;  %v26_v7 = vmul.f32 %v436_v2, %v14_v0  ;;  %v27_v8 = vmul.f32 %v441_v3, %v14_v0  ;;  %v15_v20 = vld [vmem:[%s617_s0 + $0x8] sm:$0x1f] }
   0x3   :  { %v451_v5 = vld [vmem:[%s618_s1 + $0x20] sm:$0x1f]  ;;  %v25_v6 = vmul.f32 %v431_v1, %v14_v0  ;;  %v28_v9 = vmul.f32 %v446_v4, %v14_v0  ;;  %v30_v31 = vmul.f32 %v431_v1, %v15_v20  ;;  %v31_v32 = vmul.f32 %v436_v2, %v15_v20 }
   0x4   :  { %v29_v10 = vmul.f32 %v451_v5, %v14_v0  ;;  %v461_v11 = vld [vmem:[%s619_s2] sm:$0x1f]  ;;  %v63_v13 = vsel %vm55_vm0, %v26_v7, 0.0  ;;  %v70_v18 = vsel %vm55_vm0, %v27_v8, 0.0  ;;  %v32_v36 = vmul.f32 %v441_v3, %v15_v20 }
   0x5   :  { %v56_v12 = vsel %vm55_vm0, %v25_v6, 0.0  ;;  %v466_v14 = vrot.slane %v461_v11, 1  ;;  %v469_v15 = vrot.slane %v461_v11, 2  ;;  %v64_v17 = vrot.slane %v63_v13, 4 }
   0x6   :  { %v57_v16 = vrot.slane %v56_v12, 4  ;;  %v77_v19 = vsel %vm55_vm0, %v28_v9, 0.0  ;;  %v71_v21 = vrot.slane %v70_v18, 4  ;;  %v84_v23 = vsel %vm55_vm0, %v29_v10, 0.0 }
   0x7   :  { %v78_v22 = vrot.slane %v77_v19, 4  ;;  %v478_v24 = vrot.slane %v461_v11, 3  ;;  %v65_v26 = vadd.f32 %v64_v17, %v63_v13  ;;  %v85_v27 = vrot.slane %v84_v23, 4 }
   0x8   :  { %v58_v25 = vadd.f32 %v57_v16, %v56_v12  ;;  %v481_v28 = vrot.slane %v461_v11, 4  ;;  %v72_v29 = vadd.f32 %v71_v21, %v70_v18  ;;  %v33_v39 = vmul.f32 %v446_v4, %v15_v20 }
   0x9   :  { %v79_v30 = vadd.f32 %v78_v22, %v77_v19  ;;  %v66_v34 = vrot.slane %v65_v26, 2  ;;  %v86_v35 = vadd.f32 %v85_v27, %v84_v23  ;;  %v34_v40 = vmul.f32 %v451_v5, %v15_v20 }
   0xa   :  { %v59_v33 = vrot.slane %v58_v25, 2  ;;  %v73_v37 = vrot.slane %v72_v29, 2  ;;  %v91_v44 = vsel %vm55_vm0, %v30_v31, 0.0  ;;  %v98_v48 = vsel %vm55_vm0, %v31_v32, 0.0 }
   0xb   :  { %v80_v38 = vrot.slane %v79_v30, 2  ;;  %v67_v42 = vadd.f32 %v66_v34, %v65_v26  ;;  %v87_v43 = vrot.slane %v86_v35, 2  ;;  %v92_v47 = vrot.slane %v91_v44, 4 }
   0xc   :  { %v60_v41 = vadd.f32 %v59_v33, %v58_v25  ;;  %v74_v45 = vadd.f32 %v73_v37, %v72_v29  ;;  %vm347_vm4 = vcmask 1044484   ;;  %v99_v52 = vrot.slane %v98_v48, 4 }
   0xd   :  { %v81_v46 = vadd.f32 %v80_v38, %v79_v30  ;;  %v68_v50 = vrot.slane %v67_v42, 1  ;;  %v88_v51 = vadd.f32 %v87_v43, %v86_v35  ;;  %v93_v55 = vadd.f32 %v92_v47, %v91_v44  ;;  %v16_v35 = vld [vmem:[%s617_s0 + $0x10] sm:$0x1f] }
   0xe   :  { %v61_v49 = vrot.slane %v60_v41, 1  ;;  %v75_v53 = vrot.slane %v74_v45, 1  ;;  %v105_v56 = vsel %vm55_vm0, %v32_v36, 0.0  ;;  %v100_v60 = vadd.f32 %v99_v52, %v98_v48 }
   0xf   :  { %v82_v54 = vrot.slane %v81_v46, 1  ;;  %v69_v58 = vadd.f32 %v68_v50, %v67_v42  ;;  %v89_v59 = vrot.slane %v88_v51, 1  ;;  %v94_v63 = vrot.slane %v93_v55, 2 }
  0x10   :  { %v62_v57 = vadd.f32 %v61_v49, %v60_v41  ;;  %v76_v61 = vadd.f32 %v75_v53, %v74_v45  ;;  %v106_v0 = vrot.slane %v105_v56, 4  ;;  %v101_v9 = vrot.slane %v100_v60, 2 }
  0x11   :  { %v83_v62 = vadd.f32 %v82_v54, %v81_v46  ;;  %v90_v6 = vadd.f32 %v89_v59, %v88_v51  ;;  %v278_v8 = vadd.f32 %v466_v14, %v69_v58  ;;  %v95_v13 = vadd.f32 %v94_v63, %v93_v55 }
  0x12   :  { %v277_v7 = vadd.f32 %v461_v11, %v62_v57  ;;  %v279_v10 = vadd.f32 %v469_v15, %v76_v61  ;;  %v107_v16 = vadd.f32 %v106_v0, %v105_v56  ;;  %v102_v19 = vadd.f32 %v101_v9, %v100_v60 }
  0x13   :  { %v280_v12 = vadd.f32 %v478_v24, %v83_v62  ;;  %v281_v17 = vadd.f32 %v481_v28, %v90_v6  ;;  %v337_v18 = vrot.slane %v278_v8, 7  ;;  %v112_v20 = vsel %vm55_vm0, %v33_v39, 0.0 }
  0x14   :  { %v340_v21 = vrot.slane %v279_v10, 6  ;;  %v96_v23 = vrot.slane %v95_v13, 1  ;;  %v108_v25 = vrot.slane %v107_v16, 2  ;;  %v103_v29 = vrot.slane %v102_v19, 1 }
  0x15   :  { %v343_v22 = vrot.slane %v280_v12, 5  ;;  %v339_v26 = vsel %vm338_vm1, %v337_v18, %v277_v7  ;;  %v346_v27 = vrot.slane %v281_v17, 4  ;;  %v113_v30 = vrot.slane %v112_v20, 4 }
  0x16   :  { %v342_v31 = vsel %vm341_vm2, %v340_v21, %v339_v26  ;;  %v97_v32 = vadd.f32 %v96_v23, %v95_v13  ;;  %v109_v33 = vadd.f32 %v108_v25, %v107_v16  ;;  %v119_v34 = vsel %vm55_vm0, %v34_v40, 0.0  ;;  %v17_v25 = vld [vmem:[%s617_s0 + $0x18] sm:$0x1f] }
  0x17   :  { %v345_v36 = vsel %vm344_vm3, %v343_v22, %v342_v31  ;;  %v104_v37 = vadd.f32 %v103_v29, %v102_v19  ;;  %v114_v38 = vadd.f32 %v113_v30, %v112_v20  ;;  %v120_v39 = vrot.slane %v119_v34, 4 }
  0x18   :  { %v348_v41 = vsel %vm347_vm4, %v346_v27, %v345_v36  ;;  %v110_v42 = vrot.slane %v109_v33, 1  ;;  %v282_v43 = vadd.f32 %v461_v11, %v97_v32  ;;  %v35_v44 = vmul.f32 %v431_v1, %v16_v35 }
  0x19   :  { %395 = vst [vmem:[%s620_s3] sm:$0x1f] %v348_v41  ;;  %v115_v40 = vrot.slane %v114_v38, 2  ;;  %v121_v45 = vadd.f32 %v120_v39, %v119_v34  ;;  %v283_v46 = vadd.f32 %v466_v14, %v104_v37  ;;  %v36_v47 = vmul.f32 %v436_v2, %v16_v35 }
  0x1a   :  { %v111_v48 = vadd.f32 %v110_v42, %v109_v33  ;;  %v37_v49 = vmul.f32 %v441_v3, %v16_v35  ;;  %v38_v50 = vmul.f32 %v446_v4, %v16_v35  ;;  %v39_v51 = vmul.f32 %v451_v5, %v16_v35 }
  0x1b   :  { %v116_v52 = vadd.f32 %v115_v40, %v114_v38  ;;  %v122_v53 = vrot.slane %v121_v45, 2  ;;  %v349_v54 = vrot.slane %v283_v46, 7  ;;  %v126_v55 = vsel %vm55_vm0, %v35_v44, 0.0 }
  0x1c   :  { %v284_v56 = vadd.f32 %v469_v15, %v111_v48  ;;  %v127_v57 = vrot.slane %v126_v55, 4  ;;  %v133_v58 = vsel %vm55_vm0, %v36_v47, 0.0  ;;  %v140_v59 = vsel %vm55_vm0, %v37_v49, 0.0 }
  0x1d   :  { %v117_v60 = vrot.slane %v116_v52, 1  ;;  %v123_v61 = vadd.f32 %v122_v53, %v121_v45  ;;  %v350_v62 = vsel %vm338_vm1, %v349_v54, %v282_v43  ;;  %v134_v63 = vrot.slane %v133_v58, 4 }
  0x1e   :  { %v351_v0 = vrot.slane %v284_v56, 6  ;;  %v128_v6 = vadd.f32 %v127_v57, %v126_v55  ;;  %v141_v7 = vrot.slane %v140_v59, 4  ;;  %v147_v8 = vsel %vm55_vm0, %v38_v50, 0.0 }
  0x1f   :  { %v118_v9 = vadd.f32 %v117_v60, %v116_v52  ;;  %v124_v10 = vrot.slane %v123_v61, 1  ;;  %v135_v12 = vadd.f32 %v134_v63, %v133_v58  ;;  %v148_v13 = vrot.slane %v147_v8, 4 }
  0x20   :  { %v352_v16 = vsel %vm341_vm2, %v351_v0, %v350_v62  ;;  %v129_v17 = vrot.slane %v128_v6, 2  ;;  %v142_v18 = vadd.f32 %v141_v7, %v140_v59  ;;  %v154_v19 = vsel %vm55_vm0, %v39_v51, 0.0 }
  0x21   :  { %v125_v20 = vadd.f32 %v124_v10, %v123_v61  ;;  %v285_v21 = vadd.f32 %v478_v24, %v118_v9  ;;  %v136_v22 = vrot.slane %v135_v12, 2  ;;  %v149_v23 = vadd.f32 %v148_v13, %v147_v8 }
  0x22   :  { %v130_v26 = vadd.f32 %v129_v17, %v128_v6  ;;  %v143_v27 = vrot.slane %v142_v18, 2  ;;  %v155_v29 = vrot.slane %v154_v19, 4  ;;  %v40_v30 = vmul.f32 %v431_v1, %v17_v25 }
  0x23   :  { %v286_v31 = vadd.f32 %v481_v28, %v125_v20  ;;  %v353_v32 = vrot.slane %v285_v21, 5  ;;  %v137_v33 = vadd.f32 %v136_v22, %v135_v12  ;;  %v150_v34 = vrot.slane %v149_v23, 2 }
  0x24   :  { %v131_v35 = vrot.slane %v130_v26, 1  ;;  %v144_v36 = vadd.f32 %v143_v27, %v142_v18  ;;  %v156_v37 = vadd.f32 %v155_v29, %v154_v19  ;;  %v41_v38 = vmul.f32 %v436_v2, %v17_v25 }
  0x25   :  { %v354_v39 = vsel %vm344_vm3, %v353_v32, %v352_v16  ;;  %v355_v41 = vrot.slane %v286_v31, 4  ;;  %v138_v42 = vrot.slane %v137_v33, 1  ;;  %v151_v43 = vadd.f32 %v150_v34, %v149_v23  ;;  %v18_v23 = vld [vmem:[%s617_s0 + $0x20] sm:$0x1f] }
  0x26   :  { %v132_v44 = vadd.f32 %v131_v35, %v130_v26  ;;  %v145_v40 = vrot.slane %v144_v36, 1  ;;  %v157_v45 = vrot.slane %v156_v37, 2  ;;  %v42_v46 = vmul.f32 %v441_v3, %v17_v25 }
  0x27   :  { %v356_v47 = vsel %vm347_vm4, %v355_v41, %v354_v39  ;;  %v139_v48 = vadd.f32 %v138_v42, %v137_v33  ;;  %v152_v49 = vrot.slane %v151_v43, 1  ;;  %v43_v50 = vmul.f32 %v446_v4, %v17_v25 }
  0x28   :  { %396 = vst [vmem:[%s620_s3 + $0x8] sm:$0x1f] %v356_v47  ;;  %v146_v51 = vadd.f32 %v145_v40, %v144_v36  ;;  %v158_v52 = vadd.f32 %v157_v45, %v156_v37  ;;  %v287_v53 = vadd.f32 %v461_v11, %v132_v44  ;;  %v44_v54 = vmul.f32 %v451_v5, %v17_v25 }
  0x29   :  { %v153_v55 = vadd.f32 %v152_v49, %v151_v43  ;;  %v288_v56 = vadd.f32 %v466_v14, %v139_v48  ;;  %v161_v57 = vsel %vm55_vm0, %v40_v30, 0.0  ;;  %v168_v58 = vsel %vm55_vm0, %v41_v38, 0.0 }
  0x2a   :  { %v159_v59 = vrot.slane %v158_v52, 1  ;;  %v289_v60 = vadd.f32 %v469_v15, %v146_v51  ;;  %v162_v61 = vrot.slane %v161_v57, 4  ;;  %v169_v62 = vrot.slane %v168_v58, 4 }
  0x2b   :  { %v290_v63 = vadd.f32 %v478_v24, %v153_v55  ;;  %v357_v0 = vrot.slane %v288_v56, 7  ;;  %v175_v6 = vsel %vm55_vm0, %v42_v46, 0.0  ;;  %v182_v7 = vsel %vm55_vm0, %v43_v50, 0.0 }
  0x2c   :  { %v160_v8 = vadd.f32 %v159_v59, %v158_v52  ;;  %v359_v9 = vrot.slane %v289_v60, 6  ;;  %v163_v10 = vadd.f32 %v162_v61, %v161_v57  ;;  %v170_v12 = vadd.f32 %v169_v62, %v168_v58 }
  0x2d   :  { %v358_v13 = vsel %vm338_vm1, %v357_v0, %v287_v53  ;;  %v361_v16 = vrot.slane %v290_v63, 5  ;;  %v176_v17 = vrot.slane %v175_v6, 4  ;;  %v183_v18 = vrot.slane %v182_v7, 4 }
  0x2e   :  { %v291_v19 = vadd.f32 %v481_v28, %v160_v8  ;;  %v360_v20 = vsel %vm341_vm2, %v359_v9, %v358_v13  ;;  %v164_v21 = vrot.slane %v163_v10, 2  ;;  %v171_v22 = vrot.slane %v170_v12, 2 }
  0x2f   :  { %v362_v25 = vsel %vm344_vm3, %v361_v16, %v360_v20  ;;  %v177_v26 = vadd.f32 %v176_v17, %v175_v6  ;;  %v184_v27 = vadd.f32 %v183_v18, %v182_v7  ;;  %v189_v29 = vsel %vm55_vm0, %v44_v54, 0.0 }
  0x30   :  { %v363_v30 = vrot.slane %v291_v19, 4  ;;  %v165_v31 = vadd.f32 %v164_v21, %v163_v10  ;;  %v172_v32 = vadd.f32 %v171_v22, %v170_v12  ;;  %v190_v33 = vrot.slane %v189_v29, 4 }
  0x31   :  { %v178_v34 = vrot.slane %v177_v26, 2  ;;  %v185_v35 = vrot.slane %v184_v27, 2  ;;  %v45_v36 = vmul.f32 %v431_v1, %v18_v23  ;;  %v46_v37 = vmul.f32 %v436_v2, %v18_v23 }
  0x32   :  { %v364_v38 = vsel %vm347_vm4, %v363_v30, %v362_v25  ;;  %v166_v39 = vrot.slane %v165_v31, 1  ;;  %v173_v41 = vrot.slane %v172_v32, 1  ;;  %v191_v42 = vadd.f32 %v190_v33, %v189_v29 }
  0x33   :  { %397 = vst [vmem:[%s620_s3 + $0x10] sm:$0x1f] %v364_v38  ;;  %v179_v43 = vadd.f32 %v178_v34, %v177_v26  ;;  %v186_v44 = vadd.f32 %v185_v35, %v184_v27  ;;  %v47_v40 = vmul.f32 %v441_v3, %v18_v23  ;;  %v48_v45 = vmul.f32 %v446_v4, %v18_v23 }
  0x34   :  { %v167_v46 = vadd.f32 %v166_v39, %v165_v31  ;;  %v174_v47 = vadd.f32 %v173_v41, %v172_v32  ;;  %v192_v48 = vrot.slane %v191_v42, 2  ;;  %v49_v49 = vmul.f32 %v451_v5, %v18_v23  ;;  %v19_v32 = vld [vmem:[%s617_s0 + $0x28] sm:$0x1f] }
  0x35   :  { %v180_v50 = vrot.slane %v179_v43, 1  ;;  %v187_v51 = vrot.slane %v186_v44, 1  ;;  %v196_v52 = vsel %vm55_vm0, %v45_v36, 0.0  ;;  %v203_v53 = vsel %vm55_vm0, %v46_v37, 0.0 }
  0x36   :  { %v193_v54 = vadd.f32 %v192_v48, %v191_v42  ;;  %v292_v55 = vadd.f32 %v461_v11, %v167_v46  ;;  %v293_v56 = vadd.f32 %v466_v14, %v174_v47  ;;  %v197_v57 = vrot.slane %v196_v52, 4 }
  0x37   :  { %v181_v58 = vadd.f32 %v180_v50, %v179_v43  ;;  %v188_v59 = vadd.f32 %v187_v51, %v186_v44  ;;  %v204_v60 = vrot.slane %v203_v53, 4  ;;  %v210_v61 = vsel %vm55_vm0, %v47_v40, 0.0 }
  0x38   :  { %v194_v62 = vrot.slane %v193_v54, 1  ;;  %v365_v63 = vrot.slane %v293_v56, 7  ;;  %v198_v0 = vadd.f32 %v197_v57, %v196_v52  ;;  %v211_v6 = vrot.slane %v210_v61, 4 }
  0x39   :  { %v294_v7 = vadd.f32 %v469_v15, %v181_v58  ;;  %v295_v8 = vadd.f32 %v478_v24, %v188_v59  ;;  %v205_v9 = vadd.f32 %v204_v60, %v203_v53  ;;  %v217_v10 = vsel %vm55_vm0, %v48_v45, 0.0 }
  0x3a   :  { %v195_v12 = vadd.f32 %v194_v62, %v193_v54  ;;  %v366_v13 = vsel %vm338_vm1, %v365_v63, %v292_v55  ;;  %v199_v16 = vrot.slane %v198_v0, 2  ;;  %v212_v17 = vadd.f32 %v211_v6, %v210_v61 }
  0x3b   :  { %v367_v18 = vrot.slane %v294_v7, 6  ;;  %v369_v19 = vrot.slane %v295_v8, 5  ;;  %v206_v20 = vrot.slane %v205_v9, 2  ;;  %v218_v21 = vrot.slane %v217_v10, 4 }
  0x3c   :  { %v296_v22 = vadd.f32 %v481_v28, %v195_v12  ;;  %v200_v23 = vadd.f32 %v199_v16, %v198_v0  ;;  %v213_v25 = vrot.slane %v212_v17, 2  ;;  %v224_v26 = vsel %vm55_vm0, %v49_v49, 0.0 }
  0x3d   :  { %v368_v27 = vsel %vm341_vm2, %v367_v18, %v366_v13  ;;  %v207_v29 = vadd.f32 %v206_v20, %v205_v9  ;;  %v219_v30 = vadd.f32 %v218_v21, %v217_v10  ;;  %v225_v31 = vrot.slane %v224_v26, 4 }
  0x3e   :  { %v370_v33 = vsel %vm344_vm3, %v369_v19, %v368_v27  ;;  %v371_v34 = vrot.slane %v296_v22, 4  ;;  %v201_v35 = vrot.slane %v200_v23, 1  ;;  %v214_v36 = vadd.f32 %v213_v25, %v212_v17 }
  0x3f   :  { %v208_v37 = vrot.slane %v207_v29, 1  ;;  %v220_v38 = vrot.slane %v219_v30, 2  ;;  %v226_v39 = vadd.f32 %v225_v31, %v224_v26  ;;  %v50_v41 = vmul.f32 %v431_v1, %v19_v32 }
  0x40   :  { %v372_v42 = vsel %vm347_vm4, %v371_v34, %v370_v33  ;;  %v202_v43 = vadd.f32 %v201_v35, %v200_v23  ;;  %v215_v44 = vrot.slane %v214_v36, 1  ;;  %v51_v40 = vmul.f32 %v436_v2, %v19_v32 }
  0x41   :  { %398 = vst [vmem:[%s620_s3 + $0x18] sm:$0x1f] %v372_v42  ;;  %v209_v45 = vadd.f32 %v208_v37, %v207_v29  ;;  %v221_v46 = vadd.f32 %v220_v38, %v219_v30  ;;  %v227_v47 = vrot.slane %v226_v39, 2  ;;  %v52_v48 = vmul.f32 %v441_v3, %v19_v32 }
  0x42   :  { %v216_v49 = vadd.f32 %v215_v44, %v214_v36  ;;  %v297_v50 = vadd.f32 %v461_v11, %v202_v43  ;;  %v53_v1 = vmul.f32 %v446_v4, %v19_v32  ;;  %v54_v51 = vmul.f32 %v451_v5, %v19_v32 }
  0x43   :  { %v222_v52 = vrot.slane %v221_v46, 1  ;;  %v228_v53 = vadd.f32 %v227_v47, %v226_v39  ;;  %v298_v2 = vadd.f32 %v466_v14, %v209_v45  ;;  %v231_v54 = vsel %vm55_vm0, %v50_v41, 0.0 }
  0x44   :  { %v299_v55 = vadd.f32 %v469_v15, %v216_v49  ;;  %v232_v56 = vrot.slane %v231_v54, 4  ;;  %v238_v57 = vsel %vm55_vm0, %v51_v40, 0.0  ;;  %v245_v3 = vsel %vm55_vm0, %v52_v48, 0.0 }
  0x45   :  { %v223_v58 = vadd.f32 %v222_v52, %v221_v46  ;;  %v229_v59 = vrot.slane %v228_v53, 1  ;;  %v373_v60 = vrot.slane %v298_v2, 7  ;;  %v239_v61 = vrot.slane %v238_v57, 4 }
  0x46   :  { %v375_v4 = vrot.slane %v299_v55, 6  ;;  %v233_v62 = vadd.f32 %v232_v56, %v231_v54  ;;  %v246_v5 = vrot.slane %v245_v3, 4  ;;  %v252_v63 = vsel %vm55_vm0, %v53_v1, 0.0 }
  0x47   :  { %v230_v0 = vadd.f32 %v229_v59, %v228_v53  ;;  %v300_v6 = vadd.f32 %v478_v24, %v223_v58  ;;  %v374_v7 = vsel %vm338_vm1, %v373_v60, %v297_v50  ;;  %v240_v8 = vadd.f32 %v239_v61, %v238_v57 }
  0x48   :  { %v376_v9 = vsel %vm341_vm2, %v375_v4, %v374_v7  ;;  %v234_v10 = vrot.slane %v233_v62, 2  ;;  %v247_v12 = vadd.f32 %v246_v5, %v245_v3  ;;  %v253_v13 = vrot.slane %v252_v63, 4 }
  0x49   :  { %v301_v16 = vadd.f32 %v481_v28, %v230_v0  ;;  %v377_v17 = vrot.slane %v300_v6, 5  ;;  %v241_v18 = vrot.slane %v240_v8, 2  ;;  %v259_v19 = vsel %vm55_vm0, %v54_v51, 0.0 }
  0x4a   :  { %v235_v20 = vadd.f32 %v234_v10, %v233_v62  ;;  %v248_v21 = vrot.slane %v247_v12, 2  ;;  %v254_v22 = vadd.f32 %v253_v13, %v252_v63  ;;  %v260_v23 = vrot.slane %v259_v19, 4 }
  0x4b   :  { %v378_v25 = vsel %vm344_vm3, %v377_v17, %v376_v9  ;;  %v379_v26 = vrot.slane %v301_v16, 4  ;;  %v242_v27 = vadd.f32 %v241_v18, %v240_v8 }
  0x4c   :  { %v236_v29 = vrot.slane %v235_v20, 1  ;;  %v249_v30 = vadd.f32 %v248_v21, %v247_v12  ;;  %v255_v31 = vrot.slane %v254_v22, 2  ;;  %v261_v32 = vadd.f32 %v260_v23, %v259_v19 }
  0x4d   :  { %v380_v33 = vsel %vm347_vm4, %v379_v26, %v378_v25  ;;  %v243_v34 = vrot.slane %v242_v27, 1 }
  0x4e   :  { %399 = vst [vmem:[%s620_s3 + $0x20] sm:$0x1f] %v380_v33  ;;  %v237_v35 = vadd.f32 %v236_v29, %v235_v20  ;;  %v250_v36 = vrot.slane %v249_v30, 1  ;;  %v256_v37 = vadd.f32 %v255_v31, %v254_v22  ;;  %v262_v38 = vrot.slane %v261_v32, 2 }
  0x4f   :  { %v244_v39 = vadd.f32 %v243_v34, %v242_v27 }
  0x50   :  { %v251_v41 = vadd.f32 %v250_v36, %v249_v30  ;;  %v257_v42 = vrot.slane %v256_v37, 1  ;;  %v263_v43 = vadd.f32 %v262_v38, %v261_v32  ;;  %v302_v44 = vadd.f32 %v461_v11, %v237_v35 }
  0x51   :  { %v303_v40 = vadd.f32 %v466_v14, %v244_v39 }
  0x52   :  { %v258_v45 = vadd.f32 %v257_v42, %v256_v37  ;;  %v264_v46 = vrot.slane %v263_v43, 1  ;;  %v304_v47 = vadd.f32 %v469_v15, %v251_v41 }
  0x53   :  { %v381_v48 = vrot.slane %v303_v40, 7 }
  0x54   :  { %v265_v49 = vadd.f32 %v264_v46, %v263_v43  ;;  %v305_v50 = vadd.f32 %v478_v24, %v258_v45  ;;  %v383_v1 = vrot.slane %v304_v47, 6 }
  0x55   :  { %v382_v51 = vsel %vm338_vm1, %v381_v48, %v302_v44 }
  0x56   :  { %v306_v52 = vadd.f32 %v481_v28, %v265_v49  ;;  %v384_v53 = vsel %vm341_vm2, %v383_v1, %v382_v51  ;;  %v385_v2 = vrot.slane %v305_v50, 5 }
  0x58   :  { %v386_v11 = vsel %vm344_vm3, %v385_v2, %v384_v53  ;;  %v387_v54 = vrot.slane %v306_v52, 4 }
  0x5a   :  { %v388_v14 = vsel %vm347_vm4, %v387_v54, %v386_v11 }
  0x5b   :  { %400 = vst [vmem:[%s620_s3 + $0x28] sm:$0x1f] %v388_v14 }

</bundles_post_ra>
